<compile_context>
chip_gen: v6e
topology: v6e:2x2x1
jax: 0.10.0
libtpu: 0.0.40
codegen_flags: <defaults>
</compile_context>

<pallas_src>
import functools

import jax
import jax.numpy as jnp
from jax import lax
from jax.experimental import pallas as pl
from jax.experimental.pallas import tpu as pltpu


def _bottleneck_kernel(xt_ref, xc_ref, xb_ref,
                       w1_ref, b1_ref, w2_ref, b2_ref, w3_ref, b3_ref,
                       out_ref, *, W, Cin, P, TH, fold_out, use_roll):
    """One (batch, row-tile) grid step of the fused Bottleneck block."""
    cdt = w1_ref.dtype                      # matmul compute dtype (bf16 or f32)
    Cout = 4 * P
    i = pl.program_id(1)                    # row-tile index
    nrt = pl.num_programs(1)

    w1 = w1_ref[...]                        # (Cin, P)
    w2 = w2_ref[...]                        # (3, 3P, P)   (ky, kx*P+ci, co)
    w3 = w3_ref[...]                        # (P, 4P)
    b1 = b1_ref[...]                        # (1, P)   f32
    b2 = b2_ref[...]                        # (1, P)   f32
    b3 = b3_ref[...]                        # (1, 4P)  f32

    # ---- conv1 (1x1, BN-scale folded) over ALL TH+2 rows in ONE matmul ----
    x_c = xc_ref[...].reshape(TH, W, Cin)                       # io dtype
    x_ext = jnp.concatenate(
        [xt_ref[...].reshape(1, W, Cin).astype(cdt),
         x_c.astype(cdt),
         xb_ref[...].reshape(1, W, Cin).astype(cdt)], axis=0)   # (TH+2, W, Cin)
    o1 = jnp.dot(x_ext.reshape((TH + 2) * W, Cin), w1,
                 preferred_element_type=jnp.float32)
    o1 = jnp.maximum(o1 + b1, 0.0).reshape(TH + 2, W, P)        # f32

    # Zero the halo rows that lie outside the image: this is exactly the SAME
    # zero-padding of conv2's input (padded rows of conv2's input are zero).
    row = lax.broadcasted_iota(jnp.int32, (TH + 2, 1, 1), 0)
    valid = ((row != 0) | (i > 0)) & ((row != TH + 1) | (i < nrt - 1))
    o1 = jnp.where(valid, o1, 0.0)

    # ---- conv2 (3x3, SAME) as 3 stacked-K matmuls -------------------------
    # Column taps dx = -1 / 0 / +1.  K-order of the lane concat is
    # [dx=-1 | dx=0 | dx=+1] x Cin; this MUST match the wrapper's w2 reshape
    # (3, 3, P, P) -> (ky, kx*P + ci, co)  (kx-major over ci).
    o1_16 = o1.astype(cdt)                                      # cast once
    if use_roll:
        # XLU roll + border-column mask (no zero-pad buffer, no column slices).
        col = lax.broadcasted_iota(jnp.int32, (1, W, 1), 1)
        left = jnp.where(col == 0, 0.0,
                         pltpu.roll(o1, shift=1, axis=1)).astype(cdt)
        right = jnp.where(col == W - 1, 0.0,
                          pltpu.roll(o1, shift=-1, axis=1)).astype(cdt)
    else:
        zc = jnp.zeros((TH + 2, 1, P), cdt)
        left = jnp.concatenate([zc, o1_16[:, :W - 1, :]], axis=1)
        right = jnp.concatenate([o1_16[:, 1:, :], zc], axis=1)
    lhs = jnp.concatenate([left, o1_16, right], axis=-1)        # (TH+2, W, 3P)

    # Accumulator starts at the (broadcast) bias: saves a separate bias add.
    acc = jnp.broadcast_to(b2, (TH * W, P)).astype(jnp.float32)
    for dy in range(3):                                         # 3 matmuls, K=3P
        acc = acc + jnp.dot(lhs[dy:dy + TH].reshape(TH * W, 3 * P), w2[dy],
                            preferred_element_type=jnp.float32)
    o2 = jnp.maximum(acc, 0.0)                                  # (TH*W, P) f32

    # ---- conv3 (1x1) + bias + residual + relu -----------------------------
    o3 = jnp.dot(o2.astype(cdt), w3, preferred_element_type=jnp.float32)
    res = x_c.reshape(TH * W, Cin).astype(jnp.float32)          # f32 residual
    out = jnp.maximum(o3 + b3 + res, 0.0)                       # (TH*W, 4P)
    if fold_out:
        # Lane-dense store: last dim W*Cout is a large multiple of 128.
        out_ref[...] = out.reshape(1, TH, W * Cout).astype(out_ref.dtype)
    else:
        out_ref[...] = out.reshape(1, TH, W, Cout).astype(out_ref.dtype)


def _vmem_cap_bytes():
    """Generation-aware VMEM budget with headroom for compiler scratch."""
    default = 128 << 20
    try:
        cap = getattr(pltpu.get_tpu_info(), "vmem_capacity_bytes", default) or default
    except Exception:
        cap = default
    if cap <= (64 << 20):
        # v7x-class (64 MiB / TensorCore): leave ~12 MiB headroom.
        return max(min(cap - (12 << 20), 52 << 20), 16 << 20)
    # v5e / v6e (128 MiB): use most of it.
    return min(int(cap * 0.82), 108 << 20)


def _vmem_limit_bytes(W, Cin, P, TH, io_bytes, cbytes, cap):
    f32 = 4
    Cout = 4 * P
    rows = TH + 2
    x_blk = rows * W * Cin * io_bytes                  # TH center + 2 halo rows
    out_blk = TH * W * Cout * f32
    weights = (Cin * P + 9 * P * P + 4 * P * P) * cbytes + 6 * Cout * f32
    interm = (rows * W * (Cin * cbytes + P * f32 + 6 * P * cbytes)
              + TH * W * (P * f32 + 2 * Cout * f32))
    est = 2 * (x_blk + out_blk) + 2 * weights + 2 * interm
    return int(min(max(est, 32 << 20), cap))


def bottleneck_forward(x, w1, s1, b1, w2, s2, b2, w3, s3, b3, *,
                       row_tile=None, target_rows=512,
                       compute_dtype=jnp.bfloat16):
    """x: (B,H,W,Cin) NHWC (f32 or bf16); w1: (Cin,P); w2: (3,3,P,P) HWIO;
    w3: (P,4P); s*/b*: folded BN scale/bias of shape (1, C).  Output has the
    same dtype as x."""
    B, H, W, Cin = x.shape
    P = w1.shape[1]
    Cout = 4 * P
    assert Cin == Cout, "identity residual requires inplanes == planes * expansion"

    # Row tile: divisor of H.  Auto mode picks the smallest divisor giving
    # TH*W >= target_rows (MXU fill / fewer grid steps), else the whole image.
    divisors = [d for d in range(1, H + 1) if H % d == 0]
    if row_tile is not None:
        TH = max(d for d in divisors if d <= max(int(row_tile), 1))
    else:
        cand = [d for d in divisors if d * W >= target_rows]
        TH = min(cand) if cand else H

    io_dtype = x.dtype
    out_dtype = io_dtype

    # Fold BN scales into the conv weights (kernel does bias + relu only).
    # NOTE: the (3,3,P,P) -> (3, 3P, P) reshape gives K-order kx-major over ci,
    #       which must match the kernel's [dx=-1 | dx=0 | dx=+1] lane concat.
    w1s = (w1 * s1.reshape(1, P)).astype(compute_dtype)                    # (Cin, P)
    w2s = (w2 * s2.reshape(1, 1, 1, P)).reshape(3, 3 * P, P).astype(compute_dtype)
    w3s = (w3 * s3.reshape(1, Cout)).astype(compute_dtype)                 # (P, 4P)
    b1f = b1.reshape(1, P).astype(jnp.float32)
    b2f = b2.reshape(1, P).astype(jnp.float32)
    b3f = b3.reshape(1, Cout).astype(jnp.float32)

    # Lane-dense output folding is only legal / useful when Cout is narrow and
    # the folded tile still obeys the (8,128) block constraints.
    fold_ok = (Cout < 128) and ((W * Cout) % 128 == 0) and (TH == H or TH % 8 == 0)

    grid = (B, H // TH)
    cbytes = jnp.dtype(compute_dtype).itemsize
    io_bytes = jnp.dtype(io_dtype).itemsize
    vmem_limit = _vmem_limit_bytes(W, Cin, P, TH, io_bytes, cbytes,
                                   _vmem_cap_bytes())

    def run(optimized):
        fold_out = fold_ok and optimized
        wkw = {"pipeline_mode": pl.Buffered(1)} if optimized else {}

        in_specs = [
            # x: 1-row top halo, TH-row center, 1-row bottom halo.  Halo row
            # indices are clamped at the image border; the kernel masks those
            # rows after conv1.  Only TH+2 rows of x are VMEM-resident / step.
            pl.BlockSpec((1, 1, W, Cin),
                         lambda b, i: (b, jnp.maximum(i * TH - 1, 0), 0, 0)),
            pl.BlockSpec((1, TH, W, Cin), lambda b, i: (b, i, 0, 0)),
            pl.BlockSpec((1, 1, W, Cin),
                         lambda b, i: (b, jnp.minimum(i * TH + TH, H - 1), 0, 0)),
            # Weights / biases: constant index maps -> VMEM-resident across the
            # grid; single-buffered when supported (they never change).
            pl.BlockSpec((Cin, P), lambda b, i: (0, 0), **wkw),
            pl.BlockSpec((1, P), lambda b, i: (0, 0), **wkw),
            pl.BlockSpec((3, 3 * P, P), lambda b, i: (0, 0, 0), **wkw),
            pl.BlockSpec((1, P), lambda b, i: (0, 0), **wkw),
            pl.BlockSpec((P, Cout), lambda b, i: (0, 0), **wkw),
            pl.BlockSpec((1, Cout), lambda b, i: (0, 0), **wkw),
        ]
        if fold_out:
            out_shape = jax.ShapeDtypeStruct((B, H, W * Cout), out_dtype)
            out_specs = pl.BlockSpec((1, TH, W * Cout), lambda b, i: (b, i, 0))
        else:
            out_shape = jax.ShapeDtypeStruct((B, H, W, Cout), out_dtype)
            out_specs = pl.BlockSpec((1, TH, W, Cout), lambda b, i: (b, i, 0, 0))

        kernel = functools.partial(_bottleneck_kernel, W=W, Cin=Cin, P=P, TH=TH,
                                   fold_out=fold_out, use_roll=optimized)
        out = pl.pallas_call(
            kernel,
            out_shape=out_shape,
            grid=grid,
            in_specs=in_specs,
            out_specs=out_specs,
            compiler_params=pltpu.CompilerParams(
                dimension_semantics=("parallel", "parallel"),
                vmem_limit_bytes=vmem_limit),
        )(x, x, x, w1s, b1f, w2s, b2f, w3s, b3f)
        if fold_out:
            out = out.reshape(B, H, W, Cout)
        return out

    # Try the fully-optimized configuration first; fall back to a conservative
    # configuration (default double-buffered weights, slice/concat column taps,
    # unfolded output) with identical numerics if this JAX/Mosaic version
    # rejects any of the optimized features.
    try:
        return jax.block_until_ready(run(True))
    except Exception:
        return run(False)


def _reference(x, w1, s1, b1, w2, s2, b2, w3, s3, b3):
    """Plain-JAX f32 reference (NHWC convolutions)."""
    dn = ("NHWC", "HWIO", "NHWC")
    Cin = x.shape[-1]
    P = w1.shape[1]
    o = lax.conv_general_dilated(x, w1.reshape(1, 1, Cin, P), (1, 1), "VALID",
                                 dimension_numbers=dn)
    o = jnp.maximum(o * s1 + b1, 0.0)
    o = lax.conv_general_dilated(o, w2, (1, 1), "SAME", dimension_numbers=dn)
    o = jnp.maximum(o * s2 + b2, 0.0)
    o = lax.conv_general_dilated(o, w3.reshape(1, 1, P, 4 * P), (1, 1), "VALID",
                                 dimension_numbers=dn)
    o = o * s3 + b3
    return jnp.maximum(o + x, 0.0)


if __name__ == "__main__":
    B, H, W = 2, 16, 16
    planes = 8
    inplanes = planes * 4           # 32: identity residual (downsample=None)

    key = jax.random.PRNGKey(0)
    keys = jax.random.split(key, 16)

    # Deterministic "PyTorch-layout" parameters (NCHW input, OIHW weights).
    x_nchw = jax.random.normal(keys[0], (B, inplanes, H, W), jnp.float32)
    w1_oihw = 0.1 * jax.random.normal(keys[1], (planes, inplanes, 1, 1), jnp.float32)
    w2_oihw = 0.1 * jax.random.normal(keys[2], (planes, planes, 3, 3), jnp.float32)
    w3_oihw = 0.1 * jax.random.normal(keys[3], (planes * 4, planes, 1, 1), jnp.float32)

    def bn_fold(kg, kb, km, kv, C):
        gamma = 1.0 + 0.1 * jax.random.normal(kg, (C,), jnp.float32)
        beta = 0.1 * jax.random.normal(kb, (C,), jnp.float32)
        mean = 0.1 * jax.random.normal(km, (C,), jnp.float32)
        var = jax.random.uniform(kv, (C,), jnp.float32, minval=0.5, maxval=1.5)
        eps = 1e-5
        scale = gamma / jnp.sqrt(var + eps)
        bias = beta - mean * scale
        return scale.reshape(1, C), bias.reshape(1, C)

    s1, b1 = bn_fold(keys[4], keys[5], keys[6], keys[7], planes)
    s2, b2 = bn_fold(keys[8], keys[9], keys[10], keys[11], planes)
    s3, b3 = bn_fold(keys[12], keys[13], keys[14], keys[15], planes * 4)

    # Layout conversion (glue): NCHW -> NHWC, OIHW -> HWIO / (Cin, Cout).
    x = jnp.transpose(x_nchw, (0, 2, 3, 1))                               # (B,H,W,Cin)
    w1 = jnp.transpose(w1_oihw, (2, 3, 1, 0)).reshape(inplanes, planes)   # (Cin, P)
    w2 = jnp.transpose(w2_oihw, (2, 3, 1, 0))                             # (3,3,P,P)
    w3 = jnp.transpose(w3_oihw, (2, 3, 1, 0)).reshape(planes, planes * 4) # (P, 4P)

    ref = _reference(x, w1, s1, b1, w2, s2, b2, w3, s3, b3)

    # Exact-semantics path (f32 matmul inputs).
    out_f32 = bottleneck_forward(x, w1, s1, b1, w2, s2, b2, w3, s3, b3,
                                 compute_dtype=jnp.float32)
    out_f32 = jax.block_until_ready(out_f32)
    assert out_f32.shape == (B, H, W, planes * 4)
    assert jnp.allclose(out_f32, ref, atol=2e-3, rtol=2e-3), "f32 mismatch vs reference"

    # Performance path: bf16 MXU inputs, f32 accumulation / bias / residual.
    out_bf16 = bottleneck_forward(x, w1, s1, b1, w2, s2, b2, w3, s3, b3,
                                  compute_dtype=jnp.bfloat16)
    out_bf16 = jax.block_until_ready(out_bf16)
    assert jnp.allclose(out_bf16, ref, atol=5e-2, rtol=5e-2), "bf16 mismatch vs reference"

    # bf16 I/O path: bf16 activations at the kernel boundary (HBM-bound layers).
    out_io = bottleneck_forward(x.astype(jnp.bfloat16),
                                w1, s1, b1, w2, s2, b2, w3, s3, b3,
                                compute_dtype=jnp.bfloat16)
    out_io = jax.block_until_ready(out_io)
    assert out_io.dtype == jnp.bfloat16
    assert jnp.allclose(out_io.astype(jnp.float32), ref,
                        atol=2e-1, rtol=1e-1), "bf16-IO mismatch vs reference"

    print("KERNEL_OK")
</pallas_src>

<mosaic_0001>
module attributes {stable_mosaic.version = 11 : i64} {
  func.func @_bottleneck_kernel(%arg0: i32, %arg1: i32, %arg2: memref<1x1x16x32xf32, #tpu.memory_space<vmem>>, %arg3: memref<1x16x16x32xf32, #tpu.memory_space<vmem>>, %arg4: memref<1x1x16x32xf32, #tpu.memory_space<vmem>>, %arg5: memref<32x8xf32, #tpu.memory_space<vmem>>, %arg6: memref<1x8xf32, #tpu.memory_space<vmem>>, %arg7: memref<3x24x8xf32, #tpu.memory_space<vmem>>, %arg8: memref<1x8xf32, #tpu.memory_space<vmem>>, %arg9: memref<8x32xf32, #tpu.memory_space<vmem>>, %arg10: memref<1x32xf32, #tpu.memory_space<vmem>>, %arg11: memref<1x16x16x32xf32, #tpu.memory_space<vmem>>) attributes {dimension_semantics = [#tpu.dimension_semantics<parallel>, #tpu.dimension_semantics<parallel>], iteration_bounds = array<i64: 2, 1>, scalar_prefetch = 0 : i64, scratch_operands = 0 : i64, tpu.core_type = #tpu.core_type<tc>, window_params = [{transform_indices = @transform_0, window_bounds = array<i64: 1, 1, 16, 32>}, {transform_indices = @transform_1, window_bounds = array<i64: 1, 16, 16, 32>}, {transform_indices = @transform_2, window_bounds = array<i64: 1, 1, 16, 32>}, {pipeline_mode = #tpu.pipeline_mode<synchronous>, transform_indices = @transform_3, window_bounds = array<i64: 32, 8>}, {pipeline_mode = #tpu.pipeline_mode<synchronous>, transform_indices = @transform_4, window_bounds = array<i64: 1, 8>}, {pipeline_mode = #tpu.pipeline_mode<synchronous>, transform_indices = @transform_5, window_bounds = array<i64: 3, 24, 8>}, {pipeline_mode = #tpu.pipeline_mode<synchronous>, transform_indices = @transform_6, window_bounds = array<i64: 1, 8>}, {pipeline_mode = #tpu.pipeline_mode<synchronous>, transform_indices = @transform_7, window_bounds = array<i64: 8, 32>}, {pipeline_mode = #tpu.pipeline_mode<synchronous>, transform_indices = @transform_8, window_bounds = array<i64: 1, 32>}, {transform_indices = @transform_9, window_bounds = array<i64: 1, 16, 16, 32>}]} {
    %c0 = arith.constant 0 : index
    %c0_0 = arith.constant 0 : index
    %0 = vector.load %arg5[%c0, %c0_0] : memref<32x8xf32, #tpu.memory_space<vmem>>, vector<32x8xf32>
    %c0_1 = arith.constant 0 : index
    %c0_2 = arith.constant 0 : index
    %c0_3 = arith.constant 0 : index
    %1 = vector.load %arg7[%c0_1, %c0_2, %c0_3] : memref<3x24x8xf32, #tpu.memory_space<vmem>>, vector<3x24x8xf32>
    %c0_4 = arith.constant 0 : index
    %c0_5 = arith.constant 0 : index
    %2 = vector.load %arg9[%c0_4, %c0_5] : memref<8x32xf32, #tpu.memory_space<vmem>>, vector<8x32xf32>
    %c0_6 = arith.constant 0 : index
    %c0_7 = arith.constant 0 : index
    %3 = vector.load %arg6[%c0_6, %c0_7] : memref<1x8xf32, #tpu.memory_space<vmem>>, vector<1x8xf32>
    %c0_8 = arith.constant 0 : index
    %c0_9 = arith.constant 0 : index
    %4 = vector.load %arg8[%c0_8, %c0_9] : memref<1x8xf32, #tpu.memory_space<vmem>>, vector<1x8xf32>
    %c0_10 = arith.constant 0 : index
    %c0_11 = arith.constant 0 : index
    %5 = vector.load %arg10[%c0_10, %c0_11] : memref<1x32xf32, #tpu.memory_space<vmem>>, vector<1x32xf32>
    %c0_12 = arith.constant 0 : index
    %c0_13 = arith.constant 0 : index
    %c0_14 = arith.constant 0 : index
    %c0_15 = arith.constant 0 : index
    %6 = vector.load %arg3[%c0_12, %c0_13, %c0_14, %c0_15] : memref<1x16x16x32xf32, #tpu.memory_space<vmem>>, vector<1x16x16x32xf32>
    %7 = vector.shape_cast %6 : vector<1x16x16x32xf32> to vector<16x16x32xf32>
    %c0_16 = arith.constant 0 : index
    %c0_17 = arith.constant 0 : index
    %c0_18 = arith.constant 0 : index
    %c0_19 = arith.constant 0 : index
    %8 = vector.load %arg2[%c0_16, %c0_17, %c0_18, %c0_19] : memref<1x1x16x32xf32, #tpu.memory_space<vmem>>, vector<1x1x16x32xf32>
    %9 = vector.shape_cast %8 : vector<1x1x16x32xf32> to vector<1x16x32xf32>
    %c0_20 = arith.constant 0 : index
    %c0_21 = arith.constant 0 : index
    %c0_22 = arith.constant 0 : index
    %c0_23 = arith.constant 0 : index
    %10 = vector.load %arg4[%c0_20, %c0_21, %c0_22, %c0_23] : memref<1x1x16x32xf32, #tpu.memory_space<vmem>>, vector<1x1x16x32xf32>
    %11 = vector.shape_cast %10 : vector<1x1x16x32xf32> to vector<1x16x32xf32>
    %12 = tpu.concatenate %9, %7, %11 in 0 : vector<1x16x32xf32>, vector<16x16x32xf32>, vector<1x16x32xf32> -> vector<18x16x32xf32>
    %13 = vector.shape_cast %12 : vector<18x16x32xf32> to vector<288x32xf32>
    %cst = arith.constant dense<0.000000e+00> : vector<288x8xf32>
    %14 = tpu.matmul %13, %0, %cst {dimension_numbers = #tpu.dot_dimension_numbers<[1], [0], [0], [1], [0, 0, 1, 1], [], []>} : vector<288x32xf32>, vector<32x8xf32>, vector<288x8xf32> -> vector<288x8xf32>
    %15 = vector.broadcast %3 : vector<1x8xf32> to vector<288x8xf32>
    %16 = arith.addf %14, %15 : vector<288x8xf32>
    %cst_24 = arith.constant 0.000000e+00 : f32
    %17 = vector.broadcast %cst_24 : f32 to vector<288x8xf32>
    %18 = arith.maximumf %16, %17 : vector<288x8xf32>
    %19 = vector.shape_cast %18 : vector<288x8xf32> to vector<18x16x8xf32>
    %20 = tpu.iota {dimensions = array<i32: 0>} : vector<18x1x1xi32>
    %c0_i32 = arith.constant 0 : i32
    %21 = vector.broadcast %c0_i32 : i32 to vector<18x1x1xi32>
    %22 = arith.cmpi ne, %20, %21 : vector<18x1x1xi32>
    %c0_i32_25 = arith.constant 0 : i32
    %23 = arith.cmpi sgt, %arg1, %c0_i32_25 : i32
    %24 = vector.broadcast %23 : i1 to vector<18x1x1xi1>
    %25 = arith.ori %22, %24 : vector<18x1x1xi1>
    %c17_i32 = arith.constant 17 : i32
    %26 = vector.broadcast %c17_i32 : i32 to vector<18x1x1xi32>
    %27 = arith.cmpi ne, %20, %26 : vector<18x1x1xi32>
    %c0_i32_26 = arith.constant 0 : i32
    %28 = arith.cmpi slt, %arg1, %c0_i32_26 : i32
    %29 = vector.broadcast %28 : i1 to vector<18x1x1xi1>
    %30 = arith.ori %27, %29 : vector<18x1x1xi1>
    %31 = arith.andi %25, %30 : vector<18x1x1xi1>
    %cst_27 = arith.constant 0.000000e+00 : f32
    %32 = vector.shape_cast %31 : vector<18x1x1xi1> to vector<18x1x1xi1>
    %33 = vector.broadcast %32 : vector<18x1x1xi1> to vector<18x16x8xi1>
    %34 = vector.broadcast %cst_27 : f32 to vector<18x16x8xf32>
    %35 = arith.select %33, %19, %34 : vector<18x16x8xi1>, vector<18x16x8xf32>
    %cst_28 = arith.constant 0.000000e+00 : f32
    %36 = vector.broadcast %cst_28 : f32 to vector<18x1x8xf32>
    %37 = vector.extract_strided_slice %35 {offsets = [0, 0, 0], sizes = [18, 15, 8], strides = [1, 1, 1]} : vector<18x16x8xf32> to vector<18x15x8xf32>
    %38 = tpu.concatenate %36, %37 in 1 : vector<18x1x8xf32>, vector<18x15x8xf32> -> vector<18x16x8xf32>
    %39 = vector.extract_strided_slice %35 {offsets = [0, 1, 0], sizes = [18, 15, 8], strides = [1, 1, 1]} : vector<18x16x8xf32> to vector<18x15x8xf32>
    %40 = tpu.concatenate %39, %36 in 1 : vector<18x15x8xf32>, vector<18x1x8xf32> -> vector<18x16x8xf32>
    %41 = tpu.concatenate %38, %35, %40 in 2 : vector<18x16x8xf32>, vector<18x16x8xf32>, vector<18x16x8xf32> -> vector<18x16x24xf32>
    %42 = vector.shape_cast %4 : vector<1x8xf32> to vector<1x8xf32>
    %43 = vector.broadcast %42 : vector<1x8xf32> to vector<256x8xf32>
    %44 = vector.extract_strided_slice %41 {offsets = [0, 0, 0], sizes = [16, 16, 24], strides = [1, 1, 1]} : vector<18x16x24xf32> to vector<16x16x24xf32>
    %45 = vector.shape_cast %44 : vector<16x16x24xf32> to vector<256x24xf32>
    %46 = vector.extract_strided_slice %1 {offsets = [0, 0, 0], sizes = [1, 24, 8], strides = [1, 1, 1]} : vector<3x24x8xf32> to vector<1x24x8xf32>
    %47 = vector.shape_cast %46 : vector<1x24x8xf32> to vector<24x8xf32>
    %cst_29 = arith.constant dense<0.000000e+00> : vector<256x8xf32>
    %48 = tpu.matmul %45, %47, %cst_29 {dimension_numbers = #tpu.dot_dimension_numbers<[1], [0], [0], [1], [0, 0, 1, 1], [], []>} : vector<256x24xf32>, vector<24x8xf32>, vector<256x8xf32> -> vector<256x8xf32>
    %49 = arith.addf %43, %48 : vector<256x8xf32>
    %50 = vector.extract_strided_slice %41 {offsets = [1, 0, 0], sizes = [16, 16, 24], strides = [1, 1, 1]} : vector<18x16x24xf32> to vector<16x16x24xf32>
    %51 = vector.shape_cast %50 : vector<16x16x24xf32> to vector<256x24xf32>
    %52 = vector.extract_strided_slice %1 {offsets = [1, 0, 0], sizes = [1, 24, 8], strides = [1, 1, 1]} : vector<3x24x8xf32> to vector<1x24x8xf32>
    %53 = vector.shape_cast %52 : vector<1x24x8xf32> to vector<24x8xf32>
    %cst_30 = arith.constant dense<0.000000e+00> : vector<256x8xf32>
    %54 = tpu.matmul %51, %53, %cst_30 {dimension_numbers = #tpu.dot_dimension_numbers<[1], [0], [0], [1], [0, 0, 1, 1], [], []>} : vector<256x24xf32>, vector<24x8xf32>, vector<256x8xf32> -> vector<256x8xf32>
    %55 = arith.addf %49, %54 : vector<256x8xf32>
    %56 = vector.extract_strided_slice %41 {offsets = [2, 0, 0], sizes = [16, 16, 24], strides = [1, 1, 1]} : vector<18x16x24xf32> to vector<16x16x24xf32>
    %57 = vector.shape_cast %56 : vector<16x16x24xf32> to vector<256x24xf32>
    %58 = vector.extract_strided_slice %1 {offsets = [2, 0, 0], sizes = [1, 24, 8], strides = [1, 1, 1]} : vector<3x24x8xf32> to vector<1x24x8xf32>
    %59 = vector.shape_cast %58 : vector<1x24x8xf32> to vector<24x8xf32>
    %cst_31 = arith.constant dense<0.000000e+00> : vector<256x8xf32>
    %60 = tpu.matmul %57, %59, %cst_31 {dimension_numbers = #tpu.dot_dimension_numbers<[1], [0], [0], [1], [0, 0, 1, 1], [], []>} : vector<256x24xf32>, vector<24x8xf32>, vector<256x8xf32> -> vector<256x8xf32>
    %61 = arith.addf %55, %60 : vector<256x8xf32>
    %cst_32 = arith.constant 0.000000e+00 : f32
    %62 = vector.broadcast %cst_32 : f32 to vector<256x8xf32>
    %63 = arith.maximumf %61, %62 : vector<256x8xf32>
    %cst_33 = arith.constant dense<0.000000e+00> : vector<256x32xf32>
    %64 = tpu.matmul %63, %2, %cst_33 {dimension_numbers = #tpu.dot_dimension_numbers<[1], [0], [0], [1], [0, 0, 1, 1], [], []>} : vector<256x8xf32>, vector<8x32xf32>, vector<256x32xf32> -> vector<256x32xf32>
    %65 = vector.shape_cast %7 : vector<16x16x32xf32> to vector<256x32xf32>
    %66 = vector.broadcast %5 : vector<1x32xf32> to vector<256x32xf32>
    %67 = arith.addf %64, %66 : vector<256x32xf32>
    %68 = arith.addf %67, %65 : vector<256x32xf32>
    %cst_34 = arith.constant 0.000000e+00 : f32
    %69 = vector.broadcast %cst_34 : f32 to vector<256x32xf32>
    %70 = arith.maximumf %68, %69 : vector<256x32xf32>
    %71 = vector.shape_cast %70 : vector<256x32xf32> to vector<1x16x16x32xf32>
    %c0_35 = arith.constant 0 : index
    %c0_36 = arith.constant 0 : index
    %c0_37 = arith.constant 0 : index
    %c0_38 = arith.constant 0 : index
    %72 = vector.load %arg11[%c0_35, %c0_36, %c0_37, %c0_38] : memref<1x16x16x32xf32, #tpu.memory_space<vmem>>, vector<1x16x16x32xf32>
    tpu.vector_store %arg11[%c0_35, %c0_36, %c0_37, %c0_38], %71 {strides = array<i32>} : memref<1x16x16x32xf32, #tpu.memory_space<vmem>>, vector<1x16x16x32xf32>,
    return
  }
  func.func @transform_0(%arg0: i32, %arg1: i32) -> (i32, i32, i32, i32) {
    %c16_i32 = arith.constant 16 : i32
    %0 = arith.muli %arg1, %c16_i32 : i32
    %c1_i32 = arith.constant 1 : i32
    %1 = arith.subi %0, %c1_i32 : i32
    %c0_i32 = arith.constant 0 : i32
    %2 = arith.maxsi %1, %c0_i32 : i32
    %c0_i32_0 = arith.constant 0 : i32
    %c0_i32_1 = arith.constant 0 : i32
    %c0_i32_2 = arith.constant 0 : i32
    return %arg0, %2, %c0_i32_0, %c0_i32_1 : i32, i32, i32, i32
  }
  func.func @transform_1(%arg0: i32, %arg1: i32) -> (i32, i32, i32, i32) {
    %c0_i32 = arith.constant 0 : i32
    %c0_i32_0 = arith.constant 0 : i32
    %c0_i32_1 = arith.constant 0 : i32
    return %arg0, %arg1, %c0_i32, %c0_i32_0 : i32, i32, i32, i32
  }
  func.func @transform_2(%arg0: i32, %arg1: i32) -> (i32, i32, i32, i32) {
    %c16_i32 = arith.constant 16 : i32
    %0 = arith.muli %arg1, %c16_i32 : i32
    %c16_i32_0 = arith.constant 16 : i32
    %1 = arith.addi %0, %c16_i32_0 : i32
    %c15_i32 = arith.constant 15 : i32
    %2 = arith.minsi %1, %c15_i32 : i32
    %c0_i32 = arith.constant 0 : i32
    %c0_i32_1 = arith.constant 0 : i32
    %c0_i32_2 = arith.constant 0 : i32
    return %arg0, %2, %c0_i32, %c0_i32_1 : i32, i32, i32, i32
  }
  func.func @transform_3(%arg0: i32, %arg1: i32) -> (i32, i32) {
    %c0_i32 = arith.constant 0 : i32
    %c0_i32_0 = arith.constant 0 : i32
    %c0_i32_1 = arith.constant 0 : i32
    return %c0_i32, %c0_i32_0 : i32, i32
  }
  func.func @transform_4(%arg0: i32, %arg1: i32) -> (i32, i32) {
    %c0_i32 = arith.constant 0 : i32
    %c0_i32_0 = arith.constant 0 : i32
    %c0_i32_1 = arith.constant 0 : i32
    return %c0_i32, %c0_i32_0 : i32, i32
  }
  func.func @transform_5(%arg0: i32, %arg1: i32) -> (i32, i32, i32) {
    %c0_i32 = arith.constant 0 : i32
    %c0_i32_0 = arith.constant 0 : i32
    %c0_i32_1 = arith.constant 0 : i32
    %c0_i32_2 = arith.constant 0 : i32
    return %c0_i32, %c0_i32_0, %c0_i32_1 : i32, i32, i32
  }
  func.func @transform_6(%arg0: i32, %arg1: i32) -> (i32, i32) {
    %c0_i32 = arith.constant 0 : i32
    %c0_i32_0 = arith.constant 0 : i32
    %c0_i32_1 = arith.constant 0 : i32
    return %c0_i32, %c0_i32_0 : i32, i32
  }
  func.func @transform_7(%arg0: i32, %arg1: i32) -> (i32, i32) {
    %c0_i32 = arith.constant 0 : i32
    %c0_i32_0 = arith.constant 0 : i32
    %c0_i32_1 = arith.constant 0 : i32
    return %c0_i32, %c0_i32_0 : i32, i32
  }
  func.func @transform_8(%arg0: i32, %arg1: i32) -> (i32, i32) {
    %c0_i32 = arith.constant 0 : i32
    %c0_i32_0 = arith.constant 0 : i32
    %c0_i32_1 = arith.constant 0 : i32
    return %c0_i32, %c0_i32_0 : i32, i32
  }
  func.func @transform_9(%arg0: i32, %arg1: i32) -> (i32, i32, i32, i32) {
    %c0_i32 = arith.constant 0 : i32
    %c0_i32_0 = arith.constant 0 : i32
    %c0_i32_1 = arith.constant 0 : i32
    return %arg0, %arg1, %c0_i32, %c0_i32_0 : i32, i32, i32, i32
  }
}

</mosaic_0001>

<bundles_post_ra>
// kernel: tpu_custom_call.1
= control target key start
LH: loop header
LB: loop body
LE: loop exit
PB: predicated region body
PF: predicated region fallthrough
CT: control target
= control target key end

     0   :  { %s5404_s0 = inlined_call_operand.hbm [shape: f32[2,16,16,32], index: 0, kind: input, shape index: {}]   ;;  %s5405_s1 = inlined_call_operand.hbm [shape: f32[2,16,16,32], index: 1, kind: input, shape index: {}]   ;;  %s5406_s2 = inlined_call_operand.hbm [shape: f32[2,16,16,32], index: 2, kind: input, shape index: {}]   ;;  %s5407_s3 = inlined_call_operand.vmem [shape: f32[32,8], index: 3, kind: input, shape index: {}]   ;;  %s5408_s4 = inlined_call_operand.vmem [shape: f32[1,8], index: 4, kind: input, shape index: {}]   ;;  %s5409_s5 = inlined_call_operand.vmem [shape: f32[3,24,8], index: 5, kind: input, shape index: {}]   ;;  %s5410_s6 = inlined_call_operand.vmem [shape: f32[1,8], index: 6, kind: input, shape index: {}]   ;;  %s5411_s7 = inlined_call_operand.vmem [shape: f32[8,32], index: 7, kind: input, shape index: {}]   ;;  %s5412_s8 = inlined_call_operand.vmem [shape: f32[1,32], index: 8, kind: input, shape index: {}]   ;;  %s5413_s9 = inlined_call_operand.hbm [shape: f32[2,16,16,32], index: 9, kind: output, shape index: {}]  }
   0x1   :  { %5429 = sst [smem:[#allocation19_spill]] %s5405_s1 }
   0x2   :  { %5430 = sst [smem:[#allocation20_spill]] %s5413_s9 }
   0x3   :  { %14 = vsyncpa [#allocation3], 0 }
   0x4   :  { %16 = vsyncpa [#allocation3 + $0x1], 0 }
   0x5   :  { %17 = vsyncpa [#allocation6], 0 }
   0x6   :  { %19 = vsyncpa [#allocation6 + $0x1], 0 }
   0x7   :  { %20 = vsyncpa [#allocation4], 0 }
   0x8   :  { %22 = vsyncpa [#allocation4 + $0x1], 0  ;;  %s4038_s30 = smov 0   ;;  %s4040_s10 = smov 0  }
   0x9   :  { %s4042_s11 = smov 0   ;;  %s4044_s12 = smov 0  }
   0xa   :  { %s4046_s13 = smov 0   ;;  %s4048_s14 = smov 0  }
   0xb LB: > { %5431 = sst [smem:[#allocation12_spill]] %s3956_s30  ;;  %s4069_s15 = sadd.s32 4294967295, %s3976_s14   ;;  %s3976_s14 = sphi %s4048_s14, %s28_s14   ;;  %s3972_s13 = sphi %s4046_s13, %s5458_s13   ;;  %s3968_s12 = sphi %s4044_s12, %s5457_s12   ;;  %s3964_s11 = sphi %s4042_s11, %s5456_s11   ;;  %s3960_s10 = sphi %s4040_s10, %s5460_s10   ;;  %s3956_s30 = sphi %s4038_s30, %s5459_s30  }
   0xc   : > { %5432 = sst [smem:[#allocation13_spill]] %s3964_s11  ;;  %s3025_s16 = sadd.s32 4294967294, %s3976_s14  }
   0xd   : > { %5433 = sst [smem:[#allocation14_spill]] %s3972_s13  ;;  %s40_s17 = sadd.s32 1, %s3972_s13 }
   0xe   : > { %s57_s18 = sadd.s32 1, %s3964_s11  ;;  %p42_p0 = scmp.ge.s32.totalorder %s40_s17, 2 }
   0xf   : > { %p64_p1 = scmp.ne.s32.totalorder %s3964_s11, %s3960_s10  ;;  %p65_p2 = scmp.eq.s32.totalorder %s3976_s14, 0 }
  0x10   : > { %p70_p3 = scmp.ne.s32.totalorder %s3960_s10, %s3956_s30  ;;  %s5462_s17 = smov (%p42_p0, %s40_s17), 0 }
  0x11   : > { %5434 = sst [smem:[#allocation15_spill]] %s5462_s17  ;;  %p4081_p4 = por %p65_p2, %p64_p1 }
  0x12   : > { %p71_p5 = scmp.eq.s32.totalorder %s4069_s15, 0  ;;  %s52_s20 = ssub.s32 %s3972_s13, %s5462_s17 }
  0x13   : > { %p286_p6 = scmp.eq.s32.totalorder %s4069_s15, 1  ;;  %p55_p7 = scmp.eq.s32.totalorder %s52_s20, 0 }
  0x14   : > { %p4089_p8 = por %p71_p5, %p70_p3  ;;  %p292_p10 = scmp.eq.s32.totalorder %s3025_s16, 1 }
  0x15   : > { %p4093_p9 = por %p286_p6, %p64_p1  ;;  %p3700_p13 = scmp.lt.s32.totalorder %s3976_s14, 2 }
  0x16   : > { %s4098_s23 = scalar_select %p55_p7, %s3964_s11, %s57_s18  }
  0x17   : > { %s5437_s22 = scalar_select %p4093_p9, 1, 0 }
  0x18   : > { %5439 = sst [smem:[#allocation17_spill]] %s4098_s23  ;;  %p4100_p11 = por %p292_p10, %p70_p3 }
  0x19   : > { %5438 = sst [smem:[#allocation16_spill]] %s5437_s22  ;;  %s4107_s25 = sand.u32 1, %s3964_s11  }
  0x1a   : > { %s5440_s24 = scalar_select %p4100_p11, 1, 0 }
  0x1b   : > { %s4110_s26 = sshll.u32 %s3972_s13, 12  ;;  %p4114_p0 = pnand %p3700_p13, %p4081_p4 }
  0x1c   : > { %5441 = sst [smem:[#allocation18_spill]] %s5440_s24  ;;  %s357_s28 = sand.u32 1, %s3976_s14  }
  0x1d   : > { %s3031_s29 = sshll.u32 %s4107_s25, 8  ;;  %s5443_s1 = sld [smem:[#allocation19_spill]] }
  0x1e   : > { %s361_s17 = scalar_lea.vmem [#allocation5], %s3031_s29  ;;  %p3037_p1 = scmp.ge.s32.totalorder %s3976_s14, 1 }
  0x1f   : > { %s371_s23 = sshll.u32 %s361_s17, 4  ;;  %p406_p2 = scmp.lt.s32.totalorder %s3976_s14, 3  ;;  %s372_s23 = int_to_ptr.vmem [resolvable:$true] %s371_s23 }
  0x20   : > { %s4126_s13 = scalar_lea.sflag [#allocation6], %s357_s28  ;;  %p3810_p3 = pneg %p4114_p0 }
  0x21   : > { %s3821_s19 = scalar_lea.vmem %s372_s23, 4096  ;;  %s3978_s11 = smov [#allocation5]  }
  0x22   : > { %p3822_p4 = scmp.ne.s32.totalorder %s372_s23, %s3821_s19  ;;  %s3826_s24 = sshll.u32 %s3978_s11, 4  ;;  %s3827_s24 = int_to_ptr.vmem [resolvable:$false] %s3826_s24 }
  0x23   : > { %s370_s20 = scalar_lea.hbm %s5443_s1, %s4110_s26  ;;  %s3828_s16 = scalar_lea.vmem %s3827_s24, 8192 }
  0x24   : > { %p3824_p5 = pnand %p3822_p4, %p3810_p3  ;;  %p3829_p7 = scmp.lt.s32.totalorder %s372_s23, %s3827_s24 }
  0x25   : > { %p3830_p10 = scmp.lt.s32.totalorder %s3828_s16, %s3821_s19 }
  0x26   : > { %p3825_p6 = pneg %p3824_p5 }
  0x27   : > { %p3831_p13 = por %p3830_p10, %p3829_p7 }
  0x29   : > { %p3832_p12 = pnand %p3831_p13, %p3825_p6 }
  0x2b   : > { %3835 = shalt.err (!%p3832_p12)
}
  0x2c   : > { %s5422_s17 = smov 128   ;;  %s5424_s28 = smov 8  }
  0x2d   : > { %3692 = dma.hbm_to_vmem [thread:$0]  (!%p4114_p0), %s370_s20, 4096, %s372_s23, %s4126_s13, %s5422_s17, %s5422_s17, %s5424_s28  }
  0x2e   : > { %p4143_p4 = pnand %p3037_p1, %p406_p2  ;;  %s3028_s24 = sshll.u32 %s4107_s25, 4 }
  0x2f   : > { %s346_s19 = scalar_lea.hbm %s5404_s0, %s4110_s26  ;;  %s334_s16 = scalar_lea.vmem [#allocation2], %s3028_s24 }
  0x30   : > { %s347_s1 = sshll.u32 %s334_s16, 4  ;;  %s385_s30 = scalar_lea.vmem [#allocation7], %s3028_s24  ;;  %s348_s1 = int_to_ptr.vmem [resolvable:$true] %s347_s1 }
  0x31   : > { %s398_s9 = sshll.u32 %s385_s30, 4  ;;  %s331_s22 = scalar_lea.sflag [#allocation3], %s4107_s25  ;;  %s4152_s9 = int_to_ptr.vmem [resolvable:$true] %s398_s9 }
  0x32   : > { %s3849_s23 = scalar_lea.vmem %s348_s1, 256  ;;  %s3981_s20 = smov [#allocation2]  }
  0x33   : > { %p3850_p12 = scmp.ne.s32.totalorder %s348_s1, %s3849_s23  ;;  %s3854_s17 = sshll.u32 %s3981_s20, 4  ;;  %s3855_s17 = int_to_ptr.vmem [resolvable:$false] %s3854_s17 }
  0x34   : > { %s3856_s28 = scalar_lea.vmem %s3855_s17, 512  ;;  %p3857_p5 = scmp.lt.s32.totalorder %s348_s1, %s3855_s17 }
  0x35   : > { %p3852_p1 = pnand %p3850_p12, %p3810_p3  ;;  %p3858_p6 = scmp.lt.s32.totalorder %s3856_s28, %s3849_s23 }
  0x37   : > { %p3853_p2 = pneg %p3852_p1  ;;  %p3859_p7 = por %p3858_p6, %p3857_p5 }
  0x39   : > { %p3860_p10 = pnand %p3859_p7, %p3853_p2 }
  0x3b   : > { %3863 = shalt.err (!%p3860_p10)
}
  0x3c   : > { %s5445_s30 = smov 8   ;;  %s5446_s24 = smov 128  }
  0x3d   : > { %3689 = dma.hbm_to_vmem [thread:$0]  (!%p4114_p0), %s346_s19, 256, %s348_s1, %s331_s22, %s5446_s24, %s5446_s24, %s5445_s30  }
  0x3e   : > { %s3217_s25 = sadd.s32 3840, %s4110_s26  ;;  %s3877_s28 = scalar_lea.vmem %s4152_s9, 256 }
  0x3f   : > { %s397_s17 = scalar_lea.hbm %s5406_s2, %s3217_s25  ;;  %p3878_p13 = scmp.ne.s32.totalorder %s4152_s9, %s3877_s28 }
  0x40   : > { %s3982_s16 = smov [#allocation7]  }
  0x41   : > { %p3880_p12 = pnand %p3878_p13, %p3810_p3  ;;  %s3882_s23 = sshll.u32 %s3982_s16, 4  ;;  %s3883_s23 = int_to_ptr.vmem [resolvable:$false] %s3882_s23 }
  0x42   : > { %s3884_s20 = scalar_lea.vmem %s3883_s23, 512  ;;  %p3885_p2 = scmp.lt.s32.totalorder %s4152_s9, %s3883_s23 }
  0x43   : > { %p3881_p1 = pneg %p3880_p12  ;;  %p3886_p5 = scmp.lt.s32.totalorder %s3884_s20, %s3877_s28 }
  0x45   : > { %p3887_p6 = por %p3886_p5, %p3885_p2 }
  0x47   : > { %p3888_p7 = pnand %p3887_p6, %p3881_p1 }
  0x49   : > { %3891 = shalt.err (!%p3888_p7)
}
  0x4a   : > { %3695 = dma.hbm_to_vmem [thread:$0]  (!%p4114_p0), %s397_s17, 256, %s4152_s9, %s4126_s13, %s5446_s24, %s5446_s24, %s5445_s30  }
  0x4b   : > { %410 = sbr.rel (%p4143_p4) target bundleno = 1013 (0x3f5), region = 56  ;;  %s4183_s1 = sand.u32 (!%p4143_p4), 1, %s3960_s10  }
  0x4c   : > { %s3038_s22 = sshll.u32 (!%p4143_p4), %s4183_s1, 4  ;;  %s413_s26 = scalar_lea.sflag (!%p4143_p4), [#allocation3], %s4183_s1 }
  0x4d   : > { %s416_s27 = scalar_lea.vmem (!%p4143_p4), [#allocation2], %s3038_s22 }
  0x50   : > { %3943 = dma.done.wait (%p4089_p8), %s413_s26, 256  }
  0x51   : > { %3945 = vsyncadd (%p4089_p8), %s413_s26, 4294967040  ;;  %s421_s9 = sand.u32 1, %s4069_s15   ;;  %s3039_s13 = sshll.u32 %s4183_s1, 8 }
  0x52   : > { %s422_s11 = scalar_lea.sflag [#allocation6], %s421_s9  ;;  %s4197_s19 = scalar_lea.vmem [#allocation5], %s3039_s13 }
  0x53   : > { %3947 = dma.done.wait (%p4089_p8), %s422_s11, 4352  }
  0x54   : > { %3949 = vsyncadd (%p4089_p8), %s422_s11, 4294962944  ;;  %vm548_vm0 = vcmask 261120   ;;  %v492_v0 = vld [vmem:[%s5407_s3 + $0x18] sm:$0xff]  ;;  %v491_v1 = vld [vmem:[%s5407_s3 + $0x10] sm:$0xff]  ;;  %v3983_v38 = vmov 0.0   ;;  %s3984_s28 = smov 8  }
  0x55   : > { %3398 = vmatprep.subr.mxu0 %v492_v0  ;;  %v538_v2 = vld [vmem:[%s416_s27] sm:$0xff]  ;;  %v490_v3 = vld [vmem:[%s5407_s3 + $0x8] sm:$0xff]  ;;  %v509_v9 = vld [vmem:[%s4197_s19 + $0x18] sm:$0xff]  ;;  %v1132_v39 = vrot.slane %v3983_v38, 1  ;;  %3757 = vrot.lane.b32.xlu1 %v3983_v38, %s3984_s28  ;;  %vm1131_vm1 = vcmask 1046528   ;;  %s3985_s16 = smov 16  }
  0x56   : > { %3399 = vmatpush3.msra.mxu0 %v492_v0  ;;  %3406 = vmatprep.mubr.msk.f32.mxu0 %vm548_vm0, %v538_v2  ;;  %v489_v4 = vld [vmem:[%s5407_s3] sm:$0xff]  ;;  %v539_v5 = vld [vmem:[%s416_s27 + $0x8] sm:$0xff]  ;;  %v508_v8 = vld [vmem:[%s4197_s19 + $0x10] sm:$0xff]  ;;  %v4293_v45 = vrot.slane %v3983_v38, 7  ;;  %vm1456_vm2 = vcmask 64512   ;;  %vm1493_vm3 = vcmask 130048  }
  0x57   : > { %3400 = vmatprep.subr.mxu0 %v491_v1  ;;  %v506_v6 = vld [vmem:[%s4197_s19] sm:$0xff]  ;;  %v507_v7 = vld [vmem:[%s4197_s19 + $0x8] sm:$0xff]  ;;  %v512_v12 = vld [vmem:[%s4197_s19 + $0x30] sm:$0xff]  ;;  %v1204_v40 = vsel %vm1131_vm1, %v1132_v39, 0.0  ;;  %s434_s26 = scalar_lea.vmem [#allocation7], %s3038_s22  ;;  %vm1022_vm4 = vcmask 1040384  }
  0x58   : > { %3401 = vmatpush3.msra.mxu0 %v491_v1  ;;  %v510_v10 = vld [vmem:[%s4197_s19 + $0x20] sm:$0xff]  ;;  %v511_v11 = vld [vmem:[%s4197_s19 + $0x28] sm:$0xff]  ;;  %v513_v13 = vld [vmem:[%s4197_s19 + $0x38] sm:$0xff]  ;;  %v4285_v41 = vpack.i.bf16 %v1204_v40, %v1132_v39  ;;  %v4306_v54 = vsel %vm1022_vm4, 0.0, %v4293_v45  ;;  %vm1536_vm5 = vcmask 195584   ;;  %s5223_s15 = scalar_lea.vmem [#allocation8], %s3039_s13 }
  0x59   : > { %3402 = vmatprep.subr.mxu0 %v490_v3  ;;  %v514_v14 = vld [vmem:[%s4197_s19 + $0x40] sm:$0xff]  ;;  %v515_v15 = vld [vmem:[%s4197_s19 + $0x48] sm:$0xff]  ;;  %v516_v16 = vld [vmem:[%s4197_s19 + $0x50] sm:$0xff]  ;;  %s3218_s18 = sshll.u32 %s3968_s12, 12  ;;  %s2888_s21 = sshll.u32 %s5223_s15, 4  ;;  %s5353_s21 = int_to_ptr.vmem [resolvable:$true] %s2888_s21 }
  0x5a   : > { %3403 = vmatpush3.msra.mxu0 %v490_v3  ;;  %v517_v17 = vld [vmem:[%s4197_s19 + $0x58] sm:$0xff]  ;;  %v518_v18 = vld [vmem:[%s4197_s19 + $0x60] sm:$0xff]  ;;  %v519_v19 = vld [vmem:[%s4197_s19 + $0x68] sm:$0xff]  ;;  %3762 = vrot.lane.b32.xlu1 %v4285_v41, %s3985_s16  ;;  %s5451_s20 = sld [smem:[#allocation20_spill]]  ;;  %s2872_s12 = scalar_lea.sflag [#allocation4], %s4183_s1 }
  0x5b   : > { %3404 = vmatprep.subr.mxu0 %v489_v4  ;;  %v520_v20 = vld [vmem:[%s4197_s19 + $0x70] sm:$0xff]  ;;  %v521_v21 = vld [vmem:[%s4197_s19 + $0x78] sm:$0xff]  ;;  %v522_v22 = vld [vmem:[%s4197_s19 + $0x80] sm:$0xff] }
  0x5c   : > { %3405 = vmatpush3.msra.mxu0 %v489_v4  ;;  %v523_v23 = vld [vmem:[%s4197_s19 + $0x88] sm:$0xff]  ;;  %v524_v24 = vld [vmem:[%s4197_s19 + $0x90] sm:$0xff]  ;;  %v525_v25 = vld [vmem:[%s4197_s19 + $0x98] sm:$0xff] }
  0x5d   : > { %3407 = vmatmul.mubr.msk.f32.vlgmr.msra.gmra.mxu0 %vm548_vm0, %v539_v5  ;;  %v526_v26 = vld [vmem:[%s4197_s19 + $0xa0] sm:$0xff]  ;;  %v527_v27 = vld [vmem:[%s4197_s19 + $0xa8] sm:$0xff]  ;;  %v528_v28 = vld [vmem:[%s4197_s19 + $0xb0] sm:$0xff] }
  0x5e   : > { %3409 = vmatprep.mubr.msk.f32.mxu0 %vm548_vm0, %v506_v6  ;;  %v529_v29 = vld [vmem:[%s4197_s19 + $0xb8] sm:$0xff]  ;;  %v530_v30 = vld [vmem:[%s4197_s19 + $0xc0] sm:$0xff]  ;;  %v531_v31 = vld [vmem:[%s4197_s19 + $0xc8] sm:$0xff] }
  0x5f   : > { %v532_v32 = vld [vmem:[%s4197_s19 + $0xd0] sm:$0xff]  ;;  %v533_v33 = vld [vmem:[%s4197_s19 + $0xd8] sm:$0xff]  ;;  %v534_v34 = vld [vmem:[%s4197_s19 + $0xe0] sm:$0xff] }
  0x60   : > { %v535_v35 = vld [vmem:[%s4197_s19 + $0xe8] sm:$0xff]  ;;  %v536_v36 = vld [vmem:[%s4197_s19 + $0xf0] sm:$0xff]  ;;  %v537_v37 = vld [vmem:[%s4197_s19 + $0xf8] sm:$0xff] }
  0x61   : > { %3410 = vmatmul.mubr.msk.f32.gmra.mxu0 %vm548_vm0, %v507_v7  ;;  %v495_v44 = vld [vmem:[%s5409_s5 + $0x10] sm:$0xff]  ;;  %v541_v52 = vld [vmem:[%s434_s26 + $0x8] sm:$0xff]  ;;  %v493_v56 = vld [vmem:[%s5409_s5] sm:$0xff] }
  0x62   : > { %3412 = vmatprep.mubr.msk.f32.mxu0 %vm548_vm0, %v508_v8  ;;  %3460 = vmatprep.subr.mxu0 %v495_v44  ;;  %v540_v51 = vld [vmem:[%s434_s26] sm:$0xff]  ;;  %v494_v53 = vld [vmem:[%s5409_s5 + $0x8] sm:$0xff]  ;;  %s3892_s26 = scalar_lea.vmem %s5353_s21, 4096 }
  0x63   : > { %3672 = vmatprep.subr.mxu1 %v495_v44  ;;  %3461 = vmatpush3.msra.mxu0 %v495_v44  ;;  %v4319_v61 = vld [vmem:[%s5408_s4] ss:$0 sm:$0xff]  ;;  %p3893_p8 = scmp.ne.s32.totalorder %s5353_s21, %s3892_s26 }
  0x64   : > { %3675 = vmatpush3.msra.mxu1 %v495_v44  ;;  %3462 = vmatprep.subr.mxu0 %v494_v53 }
  0x65   : > { %3413 = vmatmul.mubr.msk.f32.gmra.mxu0 %vm548_vm0, %v509_v9  ;;  %3673 = vmatprep.subr.mxu1 %v494_v53  ;;  %p3894_p0 = pnand %p3893_p8, %p4093_p9 }
  0x66   : > { %3415 = vmatprep.mubr.msk.f32.mxu0 %vm548_vm0, %v510_v10  ;;  %3463 = vmatpush3.msra.mxu0 %v494_v53 }
  0x67   : > { %3676 = vmatpush3.msra.mxu1 %v494_v53  ;;  %3464 = vmatprep.subr.mxu0 %v493_v56  ;;  %p3895_p3 = pneg %p3894_p0 }
  0x68   : > { %3674 = vmatprep.subr.mxu1 %v493_v56  ;;  %3465 = vmatpush3.msra.mxu0 %v493_v56 }
  0x69   : > { %3416 = vmatmul.mubr.msk.f32.gmra.mxu0 %vm548_vm0, %v511_v11  ;;  %3677 = vmatpush3.msra.mxu1 %v493_v56 }
  0x6a   : > { %3418 = vmatprep.mubr.msk.f32.mxu0 %vm548_vm0, %v512_v12 }
  0x6d   : > { %3419 = vmatmul.mubr.msk.f32.gmra.mxu0 %vm548_vm0, %v513_v13 }
  0x6e   : > { %3421 = vmatprep.mubr.msk.f32.mxu0 %vm548_vm0, %v514_v14 }
  0x71   : > { %3422 = vmatmul.mubr.msk.f32.gmra.mxu0 %vm548_vm0, %v515_v15 }
  0x72   : > { %3424 = vmatprep.mubr.msk.f32.mxu0 %vm548_vm0, %v516_v16 }
  0x75   : > { %3425 = vmatmul.mubr.msk.f32.gmra.mxu0 %vm548_vm0, %v517_v17 }
  0x76   : > { %3427 = vmatprep.mubr.msk.f32.mxu0 %vm548_vm0, %v518_v18 }
  0x79   : > { %3428 = vmatmul.mubr.msk.f32.gmra.mxu0 %vm548_vm0, %v519_v19 }
  0x7a   : > { %3430 = vmatprep.mubr.msk.f32.mxu0 %vm548_vm0, %v520_v20 }
  0x7d   : > { %3431 = vmatmul.mubr.msk.f32.gmra.mxu0 %vm548_vm0, %v521_v21 }
  0x7e   : > { %3433 = vmatprep.mubr.msk.f32.mxu0 %vm548_vm0, %v522_v22 }
  0x81   : > { %3434 = vmatmul.mubr.msk.f32.gmra.mxu0 %vm548_vm0, %v523_v23 }
  0x82   : > { %3436 = vmatprep.mubr.msk.f32.mxu0 %vm548_vm0, %v524_v24 }
  0x85   : > { %3437 = vmatmul.mubr.msk.f32.gmra.mxu0 %vm548_vm0, %v525_v25 }
  0x86   : > { %3439 = vmatprep.mubr.msk.f32.mxu0 %vm548_vm0, %v526_v26 }
  0x89   : > { %3440 = vmatmul.mubr.msk.f32.gmra.mxu0 %vm548_vm0, %v527_v27 }
  0x8a   : > { %3442 = vmatprep.mubr.msk.f32.mxu0 %vm548_vm0, %v528_v28 }
  0x8d   : > { %3443 = vmatmul.mubr.msk.f32.gmra.mxu0 %vm548_vm0, %v529_v29 }
  0x8e   : > { %3445 = vmatprep.mubr.msk.f32.mxu0 %vm548_vm0, %v530_v30 }
  0x91   : > { %3446 = vmatmul.mubr.msk.f32.gmra.mxu0 %vm548_vm0, %v531_v31 }
  0x92   : > { %3448 = vmatprep.mubr.msk.f32.mxu0 %vm548_vm0, %v532_v32 }
  0x95   : > { %3449 = vmatmul.mubr.msk.f32.gmra.mxu0 %vm548_vm0, %v533_v33 }
  0x96   : > { %3451 = vmatprep.mubr.msk.f32.mxu0 %vm548_vm0, %v534_v34 }
  0x99   : > { %3452 = vmatmul.mubr.msk.f32.gmra.mxu0 %vm548_vm0, %v535_v35 }
  0x9a   : > { %3454 = vmatprep.mubr.msk.f32.mxu0 %vm548_vm0, %v536_v36 }
  0x9d   : > { %3455 = vmatmul.mubr.msk.f32.gmra.mxu0 %vm548_vm0, %v537_v37 }
  0x9e   : > { %3457 = vmatprep.mubr.msk.f32.mxu0 %vm548_vm0, %v540_v51 }
  0xa1   : > { %3458 = vmatmul.mubr.msk.f32.gmra.mxu0 %vm548_vm0, %v541_v52 }
  0xc7   : > { %v3758_v42 = vpop.permute.xlu1 %3757 }
  0xc8   : > { %v3760_v43 = vunpack.i.h.bf16 %v3758_v42  ;;  %v3759_v47 = vunpack.i.l.bf16 %v3758_v42 }
  0xca   : > { %v1458_v49 = vsel %vm1456_vm2, %v4293_v45, %v3760_v43  ;;  %v1457_v57 = vsel %vm1456_vm2, %v4306_v54, %v3759_v47 }
  0xcc   : > { %v3763_v46 = vpop.permute.xlu1 %3762 }
  0xcd   : > { %v3765_v48 = vunpack.i.h.bf16 %v3763_v46  ;;  %v3764_v50 = vunpack.i.l.bf16 %v3763_v46 }
  0xcf   : > { %v1495_v55 = vsel %vm1493_vm3, %v1458_v49, %v3765_v48  ;;  %v1494_v59 = vsel %vm1493_vm3, %v1457_v57, %v3764_v50 }
  0xd0   : > { %3466 = vmatprep.mubr.msk.f32.mxu0 %vm1536_vm5, %v1494_v59 }
  0xd1   : > { %3467 = vmatmul.mubr.msk.f32.vlgmr.msra.gmra.mxu0 %vm1536_vm5, %v1495_v55 }
 0x11d   : > { %v3408_v58 = vpop.f32.mrf.mxu0 }
 0x11f   : > { %v723_v60 = vpop.f32.mrf.mxu0 }
 0x121   : > { %v3411_v62 = vpop.f32.mrf.mxu0 }
 0x122   : > { %v739_v63 = vadd.f32 %v3411_v62, %v4319_v61 }
 0x123   : > { %v733_v0 = vpop.f32.mrf.mxu0 }
 0x124   : > { %v905_v1 = vmax.f32 %v739_v63, 0.0  ;;  %v734_v2 = vadd.f32 %v4319_v61, %v733_v0 }
 0x125   : > { %v3414_v3 = vpop.f32.mrf.mxu0 }
 0x126   : > { %v4324_v4 = vmax.f32 %v734_v2, 0.0  ;;  %1228 = vrot.lane.b32.xlu1 %v905_v1, %s3984_s28  ;;  %v749_v5 = vadd.f32 %v3414_v3, %v4319_v61  ;;  %v1136_v6 = vrot.slane %v905_v1, 1  ;;  %v1027_v12 = vrot.slane %v905_v1, 7 }
 0x127   : > { %v743_v7 = vpop.f32.mrf.mxu0 }
 0x128   : > { %v1026_v8 = vrot.slane %v4324_v4, 7  ;;  %v1135_v9 = vrot.slane %v4324_v4, 1  ;;  %v907_v10 = vmax.f32 %v749_v5, 0.0  ;;  %v1205_v11 = vsel %vm1131_vm1, %v1136_v6, 0.0 }
 0x129   : > { %1354 = vrot.lane.b32.xlu0 %v1205_v11, %s3985_s16  ;;  %v744_v13 = vadd.f32 %v4319_v61, %v743_v7  ;;  %v3417_v14 = vpop.f32.mrf.mxu0 }
 0x12a   : > { %1226 = vrot.lane.b32.xlu1 %v4324_v4, %s3984_s28  ;;  %v759_v15 = vadd.f32 %v3417_v14, %v4319_v61  ;;  %v1139_v16 = vrot.slane %v907_v10, 1  ;;  %v1030_v17 = vrot.slane %v907_v10, 7  ;;  %v4341_v20 = vsel %vm1022_vm4, %v1026_v8, %v1027_v12 }
 0x12b   : > { %v4336_v18 = vmax.f32 %v744_v13, 0.0  ;;  %v753_v19 = vpop.f32.mrf.mxu0  ;;  %v1137_v21 = vsel %vm1131_vm1, %v1135_v9, %v1136_v6 }
 0x12c   : > { %v909_v22 = vmax.f32 %v759_v15, 0.0  ;;  %v754_v23 = vadd.f32 %v4319_v61, %v753_v19  ;;  %v1206_v27 = vsel %vm1131_vm1, %v1139_v16, 0.0 }
 0x12d   : > { %v1029_v24 = vrot.slane %v4336_v18, 7  ;;  %1352 = vrot.lane.b32.xlu0 %v1137_v21, %s3985_s16  ;;  %v3420_v25 = vpop.f32.mrf.mxu0  ;;  %v1138_v32 = vrot.slane %v4336_v18, 1 }
 0x12e   : > { %1232 = vrot.lane.b32.xlu1 %v907_v10, %s3984_s28  ;;  %v4348_v26 = vmax.f32 %v754_v23, 0.0  ;;  %v769_v28 = vadd.f32 %v3420_v25, %v4319_v61  ;;  %v1033_v29 = vrot.slane %v909_v22, 7  ;;  %v1142_v39 = vrot.slane %v909_v22, 1 }
 0x12f   : > { %v763_v30 = vpop.f32.mrf.mxu0  ;;  %v4355_v31 = vsel %vm1022_vm4, %v1029_v24, %v1030_v17  ;;  %v1140_v46 = vsel %vm1131_vm1, %v1138_v32, %v1139_v16 }
 0x130   : > { %v1032_v33 = vrot.slane %v4348_v26, 7  ;;  %v4359_v34 = vmax.f32 %v769_v28, 0.0  ;;  %v764_v35 = vadd.f32 %v4319_v61, %v763_v30  ;;  %v1207_v51 = vsel %vm1131_vm1, %v1142_v39, 0.0 }
 0x131   : > { %1358 = vrot.lane.b32.xlu0 %v1206_v27, %s3985_s16  ;;  %v3423_v36 = vpop.f32.mrf.mxu0  ;;  %v1141_v55 = vrot.slane %v4348_v26, 1 }
 0x132   : > { %1230 = vrot.lane.b32.xlu1 %v4336_v18, %s3984_s28  ;;  %v4365_v37 = vmax.f32 %v764_v35, 0.0  ;;  %v779_v40 = vadd.f32 %v3423_v36, %v4319_v61  ;;  %v1036_v42 = vrot.slane %v4359_v34, 7  ;;  %v4372_v44 = vsel %vm1022_vm4, %v1032_v33, %v1033_v29 }
 0x133   : > { %v773_v43 = vpop.f32.mrf.mxu0  ;;  %v1145_v2 = vrot.slane %v4359_v34, 1  ;;  %v1143_v11 = vsel %vm1131_vm1, %v1141_v55, %v1142_v39 }
 0x134   : > { %v1035_v47 = vrot.slane %v4365_v37, 7  ;;  %v4376_v48 = vmax.f32 %v779_v40, 0.0  ;;  %v774_v49 = vadd.f32 %v4319_v61, %v773_v43  ;;  %v1144_v25 = vrot.slane %v4365_v37, 1 }
 0x135   : > { %1356 = vrot.lane.b32.xlu0 %v1140_v46, %s3985_s16  ;;  %v3426_v50 = vpop.f32.mrf.mxu0  ;;  %v1208_v16 = vsel %vm1131_vm1, %v1145_v2, 0.0 }
 0x136   : > { %1236 = vrot.lane.b32.xlu1 %v909_v22, %s3984_s28  ;;  %v4382_v52 = vmax.f32 %v774_v49, 0.0  ;;  %v789_v53 = vadd.f32 %v3426_v50, %v4319_v61  ;;  %v1039_v56 = vrot.slane %v4376_v48, 7  ;;  %v1148_v58 = vrot.slane %v4376_v48, 1 }
 0x137   : > { %v783_v57 = vpop.f32.mrf.mxu0  ;;  %v4391_v59 = vsel %vm1022_vm4, %v1035_v47, %v1036_v42  ;;  %v1146_v40 = vsel %vm1131_vm1, %v1144_v25, %v1145_v2 }
 0x138   : > { %v1038_v60 = vrot.slane %v4382_v52, 7  ;;  %v1147_v62 = vrot.slane %v4382_v52, 1  ;;  %v4395_v63 = vmax.f32 %v789_v53, 0.0  ;;  %v784_v0 = vadd.f32 %v4319_v61, %v783_v57 }
 0x139   : > { %1362 = vrot.lane.b32.xlu0 %v1207_v51, %s3985_s16  ;;  %v3429_v1 = vpop.f32.mrf.mxu0 }
 0x13a   : > { %1234 = vrot.lane.b32.xlu1 %v4348_v26, %s3984_s28  ;;  %v4402_v3 = vmax.f32 %v784_v0, 0.0  ;;  %v799_v5 = vadd.f32 %v3429_v1, %v4319_v61  ;;  %v1042_v6 = vrot.slane %v4395_v63, 7  ;;  %v4409_v9 = vsel %vm1131_vm1, %v1147_v62, %v1148_v58 }
 0x13b   : > { %v793_v7 = vpop.f32.mrf.mxu0  ;;  %v4414_v10 = vsel %vm1022_vm4, %v1038_v60, %v1039_v56  ;;  %v1151_v1 = vrot.slane %v4395_v63, 1 }
 0x13c   : > { %v1041_v12 = vrot.slane %v4402_v3, 7  ;;  %v4418_v13 = vmax.f32 %v799_v5, 0.0  ;;  %v794_v14 = vadd.f32 %v4319_v61, %v793_v7 }
 0x13d   : > { %1360 = vrot.lane.b32.xlu0 %v1143_v11, %s3985_s16  ;;  %v3432_v15 = vpop.f32.mrf.mxu0 }
 0x13e   : > { %1240 = vrot.lane.b32.xlu1 %v4359_v34, %s3984_s28  ;;  %v4425_v17 = vmax.f32 %v794_v14, 0.0  ;;  %v809_v19 = vadd.f32 %v3432_v15, %v4319_v61  ;;  %v1045_v21 = vrot.slane %v4418_v13, 7  ;;  %v4432_v23 = vsel %vm1022_vm4, %v1041_v12, %v1042_v6 }
 0x13f   : > { %v803_v22 = vpop.f32.mrf.mxu0 }
 0x140   : > { %v1044_v27 = vrot.slane %v4425_v17, 7  ;;  %v4436_v28 = vmax.f32 %v809_v19, 0.0  ;;  %v804_v29 = vadd.f32 %v4319_v61, %v803_v22  ;;  %v1210_v19 = vsel %vm1131_vm1, %v1151_v1, 0.0 }
 0x141   : > { %1366 = vrot.lane.b32.xlu0 %v1208_v16, %s3985_s16  ;;  %v3435_v30 = vpop.f32.mrf.mxu0 }
 0x142   : > { %1238 = vrot.lane.b32.xlu1 %v4365_v37, %s3984_s28  ;;  %v4442_v32 = vmax.f32 %v804_v29, 0.0  ;;  %v1048_v34 = vrot.slane %v4436_v28, 7  ;;  %v819_v35 = vadd.f32 %v3435_v30, %v4319_v61  ;;  %v4449_v39 = vsel %vm1022_vm4, %v1044_v27, %v1045_v21 }
 0x143   : > { %v813_v36 = vpop.f32.mrf.mxu0 }
 0x144   : > { %v1047_v42 = vrot.slane %v4442_v32, 7  ;;  %v814_v43 = vadd.f32 %v4319_v61, %v813_v36  ;;  %v4455_v46 = vmax.f32 %v819_v35, 0.0  ;;  %v1154_v35 = vrot.slane %v4418_v13, 1 }
 0x145   : > { %1364 = vrot.lane.b32.xlu0 %v1146_v40, %s3985_s16  ;;  %v3438_v49 = vpop.f32.mrf.mxu0  ;;  %v1153_v36 = vrot.slane %v4425_v17, 1 }
 0x146   : > { %1244 = vrot.lane.b32.xlu1 %v4376_v48, %s3984_s28  ;;  %v4459_v50 = vmax.f32 %v814_v43, 0.0  ;;  %v829_v51 = vadd.f32 %v3438_v49, %v4319_v61  ;;  %v1051_v53 = vrot.slane %v4455_v46, 7  ;;  %v4466_v56 = vsel %vm1022_vm4, %v1047_v42, %v1048_v34 }
 0x147   : > { %v823_v55 = vpop.f32.mrf.mxu0  ;;  %v1150_v49 = vrot.slane %v4402_v3, 1 }
 0x148   : > { %v1050_v57 = vrot.slane %v4459_v50, 7  ;;  %v4469_v62 = vmax.f32 %v829_v51, 0.0  ;;  %v824_v0 = vadd.f32 %v4319_v61, %v823_v55 }
 0x149   : > { %1248 = vrot.lane.b32.xlu0 %v4395_v63, %s3984_s28  ;;  %v3441_v2 = vpop.f32.mrf.mxu0 }
 0x14a   : > { %1242 = vrot.lane.b32.xlu1 %v4382_v52, %s3984_s28  ;;  %v4477_v5 = vmax.f32 %v824_v0, 0.0  ;;  %v839_v6 = vadd.f32 %v3441_v2, %v4319_v61  ;;  %v1054_v7 = vrot.slane %v4469_v62, 7  ;;  %v4484_v14 = vsel %vm1022_vm4, %v1050_v57, %v1051_v53 }
 0x14b   : > { %v833_v11 = vpop.f32.mrf.mxu0 }
 0x14c   : > { %v5428_v15 = vrot.slane %v4477_v5, 7  ;;  %v4487_v16 = vmax.f32 %v839_v6, 0.0  ;;  %v834_v63 = vadd.f32 %v4319_v61, %v833_v11  ;;  %v1155_v11 = vsel %vm1131_vm1, %v1153_v36, %v1154_v35 }
 0x14d   : > { %1246 = vrot.lane.b32.xlu0 %v4402_v3, %s3984_s28  ;;  %v3444_v21 = vpop.f32.mrf.mxu0 }
 0x14e   : > { %1374 = vrot.lane.b32.xlu1 %v1210_v19, %s3985_s16  ;;  %v4494_v22 = vmax.f32 %v834_v63, 0.0  ;;  %v849_v25 = vadd.f32 %v3444_v21, %v4319_v61  ;;  %v1057_v29 = vrot.slane %v4487_v16, 7  ;;  %v4501_v34 = vsel %vm1022_vm4, %v5428_v15, %v1054_v7 }
 0x14f   : > { %v843_v30 = vpop.f32.mrf.mxu0 }
 0x150   : > { %v5427_v40 = vrot.slane %v4494_v22, 7  ;;  %v844_v43 = vadd.f32 %v4319_v61, %v843_v30  ;;  %v4510_v51 = vmax.f32 %v849_v25, 0.0 }
 0x151   : > { %1250 = vrot.lane.b32.xlu0 %v4425_v17, %s3984_s28  ;;  %v3447_v53 = vpop.f32.mrf.mxu0 }
 0x152   : > { %1252 = vrot.lane.b32.xlu1 %v4418_v13, %s3984_s28  ;;  %v4514_v55 = vmax.f32 %v844_v43, 0.0  ;;  %v859_v0 = vadd.f32 %v3447_v53, %v4319_v61  ;;  %v1060_v2 = vrot.slane %v4510_v51, 7  ;;  %v4521_v7 = vsel %vm1022_vm4, %v5427_v40, %v1057_v29 }
 0x153   : > { %v853_v6 = vpop.f32.mrf.mxu0  ;;  %v1152_v13 = vsel %vm1131_vm1, %v1150_v49, %v1151_v1  ;;  %v1156_v1 = vrot.slane %v4442_v32, 1 }
 0x154   : > { %v5426_v63 = vrot.slane %v4514_v55, 7  ;;  %v854_v19 = vadd.f32 %v4319_v61, %v853_v6  ;;  %v4528_v21 = vmax.f32 %v859_v0, 0.0  ;;  %v1157_v6 = vrot.slane %v4436_v28, 1 }
 0x155   : > { %1376 = vrot.lane.b32.xlu0 %v1155_v11, %s3985_s16  ;;  %v3450_v25 = vpop.f32.mrf.mxu0  ;;  %v1211_v11 = vsel %vm1131_vm1, %v1154_v35, 0.0 }
 0x156   : > { %1372 = vrot.lane.b32.xlu1 %v1152_v13, %s3985_s16  ;;  %v4531_v30 = vmax.f32 %v854_v19, 0.0  ;;  %v869_v29 = vadd.f32 %v3450_v25, %v4319_v61  ;;  %v1063_v43 = vrot.slane %v4528_v21, 7  ;;  %v4538_v53 = vsel %vm1022_vm4, %v5426_v63, %v1060_v2 }
 0x157   : > { %v863_v36 = vpop.f32.mrf.mxu0  ;;  %v1158_v15 = vsel %vm1131_vm1, %v1156_v1, %v1157_v6  ;;  %v1160_v1 = vrot.slane %v4455_v46, 1 }
 0x158   : > { %v1062_v49 = vrot.slane %v4531_v30, 7  ;;  %v864_v0 = vadd.f32 %v4319_v61, %v863_v36  ;;  %v4547_v19 = vmax.f32 %v869_v29, 0.0 }
 0x159   : > { %1254 = vrot.lane.b32.xlu0 %v4442_v32, %s3984_s28  ;;  %v3453_v13 = vpop.f32.mrf.mxu0 }
 0x15a   : > { %1378 = vrot.lane.b32.xlu1 %v1211_v11, %s3985_s16  ;;  %v4550_v2 = vmax.f32 %v864_v0, 0.0  ;;  %v879_v25 = vadd.f32 %v3453_v13, %v4319_v61  ;;  %v1066_v63 = vrot.slane %v4547_v19, 7  ;;  %v4557_v36 = vsel %vm1022_vm4, %v1062_v49, %v1063_v43 }
 0x15b   : > { %v873_v40 = vpop.f32.mrf.mxu0 }
 0x15c   : > { %v1065_v35 = vrot.slane %v4550_v2, 7  ;;  %v874_v29 = vadd.f32 %v4319_v61, %v873_v40  ;;  %v4563_v0 = vmax.f32 %v879_v25, 0.0  ;;  %v1159_v40 = vrot.slane %v4459_v50, 1 }
 0x15d   : > { %1380 = vrot.lane.b32.xlu0 %v1158_v15, %s3985_s16 }
 0x15e   : > { %1256 = vrot.lane.b32.xlu1 %v4436_v28, %s3984_s28  ;;  %v4567_v11 = vmax.f32 %v874_v29, 0.0  ;;  %v1069_v13 = vrot.slane %v4563_v0, 7  ;;  %v4573_v43 = vsel %vm1022_vm4, %v1065_v35, %v1066_v63  ;;  %v1212_v28 = vsel %vm1131_vm1, %v1157_v6, 0.0 }
 0x15f   : > { %v1161_v63 = vsel %vm1131_vm1, %v1159_v40, %v1160_v1  ;;  %v1163_v29 = vrot.slane %v4469_v62, 1  ;;  %v1213_v6 = vsel %vm1131_vm1, %v1160_v1, 0.0  ;;  %v4602_v40 = vld [vmem:[%s5409_s5 + $0x28] sm:$0xff]  ;;  %v1166_v1 = vrot.slane %v4487_v16, 1 }
 0x160   : > { %v1068_v15 = vrot.slane %v4567_v11, 7  ;;  %3514 = vmatprep.subr.mxu1 %v4602_v40 }
 0x161   : > { %1258 = vrot.lane.b32.xlu0 %v4459_v50, %s3984_s28 }
 0x162   : > { %1382 = vrot.lane.b32.xlu1 %v1212_v28, %s3985_s16  ;;  %v4585_v25 = vsel %vm1022_vm4, %v1068_v15, %v1069_v13  ;;  %v1162_v28 = vrot.slane %v4477_v5, 1  ;;  %v1214_v13 = vsel %vm1131_vm1, %v1163_v29, 0.0 }
 0x165   : > { %1384 = vrot.lane.b32.xlu0 %v1161_v63, %s3985_s16  ;;  %v1165_v63 = vrot.slane %v4494_v22, 1 }
 0x166   : > { %1260 = vrot.lane.b32.xlu1 %v4455_v46, %s3984_s28  ;;  %v1164_v46 = vsel %vm1131_vm1, %v1162_v28, %v1163_v29  ;;  %v1169_v29 = vrot.slane %v4510_v51, 1  ;;  %v1168_v28 = vrot.slane %v4514_v55, 1 }
 0x169   : > { %1262 = vrot.lane.b32.xlu0 %v4477_v5, %s3984_s28 }
 0x16a   : > { %1386 = vrot.lane.b32.xlu1 %v1213_v6, %s3985_s16  ;;  %v1167_v6 = vsel %vm1131_vm1, %v1165_v63, %v1166_v1  ;;  %v1171_v63 = vrot.slane %v4531_v30, 1 }
 0x16d   : > { %1390 = vrot.lane.b32.xlu0 %v1214_v13, %s3985_s16  ;;  %v501_v13 = vld [vmem:[%s5409_s5 + $0x40] sm:$0xff] }
 0x16e   : > { %1264 = vrot.lane.b32.xlu1 %v4469_v62, %s3984_s28  ;;  %v1215_v62 = vsel %vm1131_vm1, %v1166_v1, 0.0  ;;  %3568 = vmatprep.subr.mxu0 %v501_v13 }
 0x16f   : > { %3569 = vmatpush3.msra.mxu0 %v501_v13  ;;  %v1174_v13 = vrot.slane %v4550_v2, 1 }
 0x171   : > { %1388 = vrot.lane.b32.xlu0 %v1164_v46, %s3985_s16  ;;  %v1170_v46 = vsel %vm1131_vm1, %v1168_v28, %v1169_v29 }
 0x172   : > { %1268 = vrot.lane.b32.xlu1 %v4487_v16, %s3984_s28  ;;  %v1216_v16 = vsel %vm1131_vm1, %v1169_v29, 0.0 }
 0x175   : > { %1266 = vrot.lane.b32.xlu0 %v4494_v22, %s3984_s28 }
 0x176   : > { %1272 = vrot.lane.b32.xlu1 %v4510_v51, %s3984_s28  ;;  %v1172_v51 = vrot.slane %v4528_v21, 1 }
 0x178   : > { %v1217_v1 = vsel %vm1131_vm1, %v1172_v51, 0.0  ;;  %v1173_v29 = vsel %vm1131_vm1, %v1171_v63, %v1172_v51  ;;  %v1178_v51 = vrot.slane %v4563_v0, 1  ;;  %v1209_v63 = vsel %vm1131_vm1, %v1148_v58, 0.0 }
 0x179   : > { %1394 = vrot.lane.b32.xlu0 %v1215_v62, %s3985_s16  ;;  %v500_v62 = vld [vmem:[%s5409_s5 + $0x38] sm:$0xff] }
 0x17a   : > { %1270 = vrot.lane.b32.xlu1 %v4514_v55, %s3984_s28  ;;  %3570 = vmatprep.subr.mxu0 %v500_v62 }
 0x17b   : > { %3571 = vmatpush3.msra.mxu0 %v500_v62  ;;  %v1219_v62 = vsel %vm1131_vm1, %v1178_v51, 0.0 }
 0x17d   : > { %1392 = vrot.lane.b32.xlu0 %v1167_v6, %s3985_s16  ;;  %v3456_v6 = vpop.f32.mrf.mxu0 }
 0x17e   : > { %1276 = vrot.lane.b32.xlu1 %v4528_v21, %s3984_s28  ;;  %v1175_v21 = vrot.slane %v4547_v19, 1  ;;  %v889_v28 = vadd.f32 %v3456_v6, %v4319_v61 }
 0x17f   : > { %v883_v6 = vpop.f32.mrf.mxu0 }
 0x181   : > { %1398 = vrot.lane.b32.xlu0 %v1216_v16, %s3985_s16  ;;  %v1218_v16 = vsel %vm1131_vm1, %v1175_v21, 0.0 }
 0x182   : > { %1274 = vrot.lane.b32.xlu1 %v4531_v30, %s3984_s28 }
 0x185   : > { %1396 = vrot.lane.b32.xlu0 %v1170_v46, %s3985_s16  ;;  %v4662_v46 = vmax.f32 %v889_v28, 0.0 }
 0x186   : > { %1280 = vrot.lane.b32.xlu1 %v4547_v19, %s3984_s28  ;;  %v499_v19 = vld [vmem:[%s5409_s5 + $0x30] sm:$0xff] }
 0x187   : > { %3572 = vmatprep.subr.mxu0 %v499_v19 }
 0x188   : > { %3573 = vmatpush3.msra.mxu0 %v499_v19  ;;  %v1114_v19 = vsel %vm1022_vm4, 0.0, %v1026_v8 }
 0x189   : > { %1402 = vrot.lane.b32.xlu0 %v1217_v1, %s3985_s16  ;;  %v1176_v1 = vsel %vm1131_vm1, %v1174_v13, %v1175_v21  ;;  %v884_v21 = vadd.f32 %v4319_v61, %v883_v6 }
 0x18a   : > { %1278 = vrot.lane.b32.xlu1 %v4550_v2, %s3984_s28 }
 0x18d   : > { %1400 = vrot.lane.b32.xlu0 %v1173_v29, %s3985_s16  ;;  %v1181_v29 = vrot.slane %v4662_v46, 1 }
 0x18e   : > { %1284 = vrot.lane.b32.xlu1 %v4563_v0, %s3984_s28  ;;  %v1177_v0 = vrot.slane %v4567_v11, 1 }
 0x18f   : > { %v1220_v58 = vsel %vm1131_vm1, %v1181_v29, 0.0 }
 0x190   : > { %v1179_v13 = vsel %vm1131_vm1, %v1177_v0, %v1178_v51 }
 0x191   : > { %1406 = vrot.lane.b32.xlu0 %v1218_v16, %s3985_s16 }
 0x192   : > { %1282 = vrot.lane.b32.xlu1 %v4567_v11, %s3984_s28 }
 0x195   : > { %1404 = vrot.lane.b32.xlu0 %v1176_v1, %s3985_s16  ;;  %v4684_v1 = vmax.f32 %v884_v21, 0.0 }
 0x196   : > { %1370 = vrot.lane.b32.xlu1 %v1209_v63, %s3985_s16 }
 0x197   : > { %v1180_v4 = vrot.slane %v4684_v1, 1 }
 0x198   : > { %v1229_v16 = vpop.permute.xlu1 %1228 }
 0x199   : > { %1410 = vrot.lane.b32.xlu0 %v1219_v62, %s3985_s16  ;;  %v1460_v61 = vsel %vm1456_vm2, %v4341_v20, %v1229_v16  ;;  %v1182_v16 = vsel %vm1131_vm1, %v1180_v4, %v1181_v29 }
 0x19a   : > { %1288 = vrot.lane.b32.xlu1 %v4662_v46, %s3984_s28 }
 0x19b   : > { %v1355_v48 = vpop.permute.xlu0 %1354 }
 0x19c   : > { %v1227_v28 = vpop.permute.xlu1 %1226  ;;  %v4693_v0 = vsel %vm1493_vm3, %v1460_v61, %v1355_v48 }
 0x19d   : > { %1408 = vrot.lane.b32.xlu0 %v1179_v13, %s3985_s16  ;;  %v1459_v63 = vsel %vm1456_vm2, %v1114_v19, %v1227_v28 }
 0x19e   : > { %1414 = vrot.lane.b32.xlu1 %v1220_v58, %s3985_s16 }
 0x19f   : > { %v1353_v62 = vpop.permute.xlu0 %1352 }
 0x1a0   : > { %v4690_v6 = vsel %vm1493_vm3, %v1459_v63, %v1353_v62  ;;  %v1233_v51 = vpop.permute.xlu1 %1232 }
 0x1a1   : > { %1368 = vrot.lane.b32.xlu0 %v4409_v9, %s3985_s16  ;;  %3469 = vmatprep.mubr.msk.f32.mxu0 %vm1536_vm5, %v4690_v6  ;;  %v1115_v9 = vsel %vm1022_vm4, 0.0, %v1029_v24  ;;  %v1462_v58 = vsel %vm1456_vm2, %v4355_v31, %v1233_v51  ;;  %v1116_v31 = vsel %vm1022_vm4, 0.0, %v1032_v33  ;;  %v1117_v33 = vsel %vm1022_vm4, 0.0, %v1035_v47 }
 0x1a2   : > { %3470 = vmatmul.mubr.msk.f32.gmra.mxu0 %vm1536_vm5, %v4693_v0  ;;  %3772 = vrot.lane.b32.xlu1 %v4285_v41, %s3985_s16  ;;  %v1118_v47 = vsel %vm1022_vm4, 0.0, %v1038_v60  ;;  %v1120_v60 = vsel %vm1022_vm4, 0.0, %v1044_v27 }
 0x1a3   : > { %v1359_v8 = vpop.permute.xlu0 %1358 }
 0x1a4   : > { %v1231_v20 = vpop.permute.xlu1 %1230  ;;  %v4717_v13 = vsel %vm1493_vm3, %v1462_v58, %v1359_v8 }
 0x1a5   : > { %1286 = vrot.lane.b32.xlu0 %v4684_v1, %s3984_s28  ;;  %v1461_v21 = vsel %vm1456_vm2, %v1115_v9, %v1231_v20 }
 0x1a7   : > { %v1357_v48 = vpop.permute.xlu0 %1356 }
 0x1a8   : > { %v4714_v28 = vsel %vm1493_vm3, %v1461_v21, %v1357_v48  ;;  %v1237_v41 = vpop.permute.xlu1 %1236 }
 0x1a9   : > { %1412 = vrot.lane.b32.xlu0 %v1182_v16, %s3985_s16  ;;  %3472 = vmatprep.mubr.msk.f32.mxu0 %vm1536_vm5, %v4714_v28  ;;  %v1464_v63 = vsel %vm1456_vm2, %v4372_v44, %v1237_v41  ;;  %s5349_s16 = scalar_lea.hbm %s5451_s20, %s3218_s18 }
 0x1aa   : > { %3473 = vmatmul.mubr.msk.f32.gmra.mxu0 %vm1536_vm5, %v4717_v13 }
 0x1ab   : > { %v1363_v18 = vpop.permute.xlu0 %1362 }
 0x1ac   : > { %v1235_v24 = vpop.permute.xlu1 %1234  ;;  %v4736_v51 = vsel %vm1493_vm3, %v1464_v63, %v1363_v18 }
 0x1ad   : > { %3767 = vrot.lane.b32.xlu0 %v3983_v38, %s3984_s28  ;;  %v1463_v29 = vsel %vm1456_vm2, %v1116_v31, %v1235_v24  ;;  %v1119_v24 = vsel %vm1022_vm4, 0.0, %v1041_v12  ;;  %v497_v12 = vld [vmem:[%s5409_s5 + $0x20] sm:$0xff] }
 0x1af   : > { %v1361_v19 = vpop.permute.xlu0 %1360 }
 0x1b0   : > { %v4733_v62 = vsel %vm1493_vm3, %v1463_v29, %v1361_v19  ;;  %v1241_v61 = vpop.permute.xlu1 %1240 }
 0x1b1   : > { %3475 = vmatprep.mubr.msk.f32.mxu0 %vm1536_vm5, %v4733_v62  ;;  %v1466_v8 = vsel %vm1456_vm2, %v4391_v59, %v1241_v61 }
 0x1b2   : > { %3476 = vmatmul.mubr.msk.f32.gmra.mxu0 %vm1536_vm5, %v4736_v51 }
 0x1b3   : > { %v1367_v38 = vpop.permute.xlu0 %1366 }
 0x1b4   : > { %v1239_v26 = vpop.permute.xlu1 %1238  ;;  %v4752_v16 = vsel %vm1493_vm3, %v1466_v8, %v1367_v38 }
 0x1b5   : > { %v1465_v44 = vsel %vm1456_vm2, %v1117_v33, %v1239_v26  ;;  %v496_v26 = vld [vmem:[%s5409_s5 + $0x18] sm:$0xff] }
 0x1b7   : > { %v1365_v4 = vpop.permute.xlu0 %1364 }
 0x1b8   : > { %v4749_v20 = vsel %vm1493_vm3, %v1465_v44, %v1365_v4  ;;  %v1245_v9 = vpop.permute.xlu1 %1244  ;;  %v1121_v44 = vsel %vm1022_vm4, 0.0, %v1047_v42 }
 0x1b9   : > { %v4756_v21 = vsel %vm1456_vm2, %v4414_v10, %v1245_v9  ;;  %3478 = vmatprep.mubr.msk.f32.mxu0 %vm1536_vm5, %v4749_v20 }
 0x1ba   : > { %3479 = vmatmul.mubr.msk.f32.gmra.mxu0 %vm1536_vm5, %v4752_v16 }
 0x1bb   : > { %v1249_v37 = vpop.permute.xlu0 %1248 }
 0x1bc   : > { %v1243_v59 = vpop.permute.xlu1 %1242  ;;  %v1470_v52 = vsel %vm1456_vm2, %v4432_v23, %v1249_v37 }
 0x1bd   : > { %v4766_v48 = vsel %vm1456_vm2, %v1118_v47, %v1243_v59  ;;  %v1122_v47 = vsel %vm1022_vm4, 0.0, %v1050_v57 }
 0x1bf   : > { %v1247_v58 = vpop.permute.xlu0 %1246 }
 0x1c0   : > { %v1375_v41 = vpop.permute.xlu1 %1374  ;;  %v1469_v29 = vsel %vm1456_vm2, %v1119_v24, %v1247_v58 }
 0x1c1   : > { %v4781_v61 = vsel %vm1493_vm3, %v1470_v52, %v1375_v41  ;;  %v5447_v52 = vrot.slane %v4477_v5, 7 }
 0x1c3   : > { %v1251_v18 = vpop.permute.xlu0 %1250 }
 0x1c4   : > { %v1253_v10 = vpop.permute.xlu1 %1252  ;;  %v1471_v3 = vsel %vm1456_vm2, %v1120_v60, %v1251_v18  ;;  %v1123_v60 = vsel %vm1022_vm4, 0.0, %v5447_v52 }
 0x1c5   : > { %v1472_v27 = vsel %vm1456_vm2, %v4449_v39, %v1253_v10  ;;  %v3459_v10 = vpop.f32.mrf.mxu0 }
 0x1c7   : > { %v1377_v31 = vpop.permute.xlu0 %1376 }
 0x1c8   : > { %v1373_v19 = vpop.permute.xlu1 %1372  ;;  %v4790_v23 = vsel %vm1493_vm3, %v1471_v3, %v1377_v31  ;;  %v893_v31 = vpop.f32.mrf.mxu0 }
 0x1c9   : > { %v4778_v63 = vsel %vm1493_vm3, %v1469_v29, %v1373_v19 }
 0x1ca   : > { %3484 = vmatprep.mubr.msk.f32.mxu1 %vm1536_vm5, %v4778_v63 }
 0x1cb   : > { %3485 = vmatmul.mubr.msk.f32.vlgmr.msra.gmra.mxu1 %vm1536_vm5, %v4781_v61  ;;  %v1255_v17 = vpop.permute.xlu0 %1254 }
 0x1cc   : > { %v1379_v38 = vpop.permute.xlu1 %1378  ;;  %3487 = vmatprep.mubr.msk.f32.mxu1 %vm1536_vm5, %v4790_v23  ;;  %3515 = vmatpush3.msra.mxu1 %v4602_v40  ;;  %v1473_v39 = vsel %vm1456_vm2, %v1121_v44, %v1255_v17 }
 0x1cd   : > { %v4803_v33 = vsel %vm1493_vm3, %v1472_v27, %v1379_v38  ;;  %3516 = vmatprep.subr.mxu1 %v497_v12 }
 0x1ce   : > { %3517 = vmatpush3.msra.mxu1 %v497_v12 }
 0x1cf   : > { %3488 = vmatmul.mubr.msk.f32.gmra.mxu1 %vm1536_vm5, %v4803_v33  ;;  %v1381_v4 = vpop.permute.xlu0 %1380  ;;  %3518 = vmatprep.subr.mxu1 %v496_v26 }
 0x1d0   : > { %v4812_v40 = vsel %vm1493_vm3, %v1473_v39, %v1381_v4  ;;  %v1257_v8 = vpop.permute.xlu1 %1256  ;;  %3519 = vmatpush3.msra.mxu1 %v496_v26  ;;  %v5448_v39 = vrot.slane %v4494_v22, 7 }
 0x1d1   : > { %3490 = vmatprep.mubr.msk.f32.mxu1 %vm1536_vm5, %v4812_v40  ;;  %v1474_v32 = vsel %vm1456_vm2, %v4466_v56, %v1257_v8 }
 0x1d2   : > { %v1124_v4 = vsel %vm1022_vm4, 0.0, %v5448_v39  ;;  %v1128_v39 = vsel %vm1022_vm4, 0.0, %v1068_v15 }
 0x1d3   : > { %v1259_v9 = vpop.permute.xlu0 %1258 }
 0x1d4   : > { %v1383_v42 = vpop.permute.xlu1 %1382  ;;  %v1475_v59 = vsel %vm1456_vm2, %v1122_v47, %v1259_v9 }
 0x1d5   : > { %v4819_v37 = vsel %vm1493_vm3, %v1474_v32, %v1383_v42 }
 0x1d6   : > { %3491 = vmatmul.mubr.msk.f32.gmra.mxu1 %vm1536_vm5, %v4819_v37 }
 0x1d7   : > { %v1385_v58 = vpop.permute.xlu0 %1384 }
 0x1d8   : > { %v4828_v41 = vsel %vm1493_vm3, %v1475_v59, %v1385_v58  ;;  %v1261_v18 = vpop.permute.xlu1 %1260 }
 0x1d9   : > { %3493 = vmatprep.mubr.msk.f32.mxu1 %vm1536_vm5, %v4828_v41  ;;  %v1476_v50 = vsel %vm1456_vm2, %v4484_v14, %v1261_v18  ;;  %v5449_v18 = vrot.slane %v4514_v55, 7 }
 0x1db   : > { %v1263_v56 = vpop.permute.xlu0 %1262 }
 0x1dc   : > { %v1387_v24 = vpop.permute.xlu1 %1386  ;;  %v1477_v12 = vsel %vm1456_vm2, %v1123_v60, %v1263_v56  ;;  %v1125_v56 = vsel %vm1022_vm4, 0.0, %v5449_v18 }
 0x1dd   : > { %v4835_v57 = vsel %vm1493_vm3, %v1476_v50, %v1387_v24 }
 0x1de   : > { %3494 = vmatmul.mubr.msk.f32.gmra.mxu1 %vm1536_vm5, %v4835_v57 }
 0x1df   : > { %v1391_v29 = vpop.permute.xlu0 %1390 }
 0x1e0   : > { %v1265_v19 = vpop.permute.xlu1 %1264 }
 0x1e1   : > { %v1478_v3 = vsel %vm1456_vm2, %v4501_v34, %v1265_v19  ;;  %v1126_v19 = vsel %vm1022_vm4, 0.0, %v1062_v49  ;;  %v1127_v49 = vsel %vm1022_vm4, 0.0, %v1065_v35 }
 0x1e2   : > { %v4851_v38 = vsel %vm1493_vm3, %v1478_v3, %v1391_v29 }
 0x1e3   : > { %v1389_v14 = vpop.permute.xlu0 %1388 }
 0x1e4   : > { %v4846_v17 = vsel %vm1493_vm3, %v1477_v12, %v1389_v14  ;;  %v1269_v27 = vpop.permute.xlu1 %1268 }
 0x1e5   : > { %3496 = vmatprep.mubr.msk.f32.mxu1 %vm1536_vm5, %v4846_v17  ;;  %v1480_v32 = vsel %vm1456_vm2, %v4521_v7, %v1269_v27 }
 0x1e6   : > { %3497 = vmatmul.mubr.msk.f32.gmra.mxu1 %vm1536_vm5, %v4851_v38 }
 0x1e7   : > { %v1267_v5 = vpop.permute.xlu0 %1266 }
 0x1e8   : > { %v1273_v26 = vpop.permute.xlu1 %1272  ;;  %v1479_v8 = vsel %vm1456_vm2, %v1124_v4, %v1267_v5 }
 0x1e9   : > { %v1482_v50 = vsel %vm1456_vm2, %v4538_v53, %v1273_v26 }
 0x1eb   : > { %v1395_v44 = vpop.permute.xlu0 %1394 }
 0x1ec   : > { %v1271_v34 = vpop.permute.xlu1 %1270  ;;  %v4865_v59 = vsel %vm1493_vm3, %v1480_v32, %v1395_v44 }
 0x1ed   : > { %v1481_v7 = vsel %vm1456_vm2, %v1125_v56, %v1271_v34 }
 0x1ef   : > { %v1393_v9 = vpop.permute.xlu0 %1392 }
 0x1f0   : > { %v4862_v42 = vsel %vm1493_vm3, %v1479_v8, %v1393_v9  ;;  %v1277_v47 = vpop.permute.xlu1 %1276 }
 0x1f1   : > { %3499 = vmatprep.mubr.msk.f32.mxu1 %vm1536_vm5, %v4862_v42  ;;  %v1484_v60 = vsel %vm1456_vm2, %v4557_v36, %v1277_v47 }
 0x1f2   : > { %3500 = vmatmul.mubr.msk.f32.gmra.mxu1 %vm1536_vm5, %v4865_v59 }
 0x1f3   : > { %v1399_v22 = vpop.permute.xlu0 %1398 }
 0x1f4   : > { %v1275_v58 = vpop.permute.xlu1 %1274  ;;  %v4881_v31 = vsel %vm1493_vm3, %v1482_v50, %v1399_v22  ;;  %v3468_v50 = vpop.f32.mrf.mxu0 }
 0x1f5   : > { %v1483_v53 = vsel %vm1456_vm2, %v1126_v19, %v1275_v58 }
 0x1f7   : > { %v1397_v10 = vpop.permute.xlu0 %1396 }
 0x1f8   : > { %v4878_v24 = vsel %vm1493_vm3, %v1481_v7, %v1397_v10  ;;  %v1281_v29 = vpop.permute.xlu1 %1280 }
 0x1f9   : > { %3502 = vmatprep.mubr.msk.f32.mxu1 %vm1536_vm5, %v4878_v24  ;;  %v1486_v26 = vsel %vm1456_vm2, %v4573_v43, %v1281_v29 }
 0x1fa   : > { %3503 = vmatmul.mubr.msk.f32.gmra.mxu1 %vm1536_vm5, %v4881_v31 }
 0x1fb   : > { %v1403_v55 = vpop.permute.xlu0 %1402 }
 0x1fc   : > { %v1279_v3 = vpop.permute.xlu1 %1278  ;;  %v4897_v14 = vsel %vm1493_vm3, %v1484_v60, %v1403_v55 }
 0x1fd   : > { %v1485_v36 = vsel %vm1456_vm2, %v1127_v49, %v1279_v3 }
 0x1ff   : > { %v1401_v52 = vpop.permute.xlu0 %1400 }
 0x200   : > { %v4894_v12 = vsel %vm1493_vm3, %v1483_v53, %v1401_v52  ;;  %v1285_v27 = vpop.permute.xlu1 %1284 }
 0x201   : > { %3505 = vmatprep.mubr.msk.f32.mxu1 %vm1536_vm5, %v4894_v12  ;;  %v1488_v8 = vsel %vm1456_vm2, %v4585_v25, %v1285_v27 }
 0x202   : > { %3506 = vmatmul.mubr.msk.f32.gmra.mxu1 %vm1536_vm5, %v4897_v14 }
 0x203   : > { %v1407_v30 = vpop.permute.xlu0 %1406 }
 0x204   : > { %v4913_v34 = vsel %vm1493_vm3, %v1486_v26, %v1407_v30  ;;  %v1283_v35 = vpop.permute.xlu1 %1282 }
 0x205   : > { %v1487_v43 = vsel %vm1456_vm2, %v1128_v39, %v1283_v35  ;;  %v5119_v35 = vld [vmem:[%s5410_s6] ss:$0 sm:$0xff] }
 0x207   : > { %v1405_v5 = vpop.permute.xlu0 %1404 }
 0x208   : > { %v4910_v44 = vsel %vm1493_vm3, %v1485_v36, %v1405_v5  ;;  %v1371_v47 = vpop.permute.xlu1 %1370 }
 0x209   : > { %3508 = vmatprep.mubr.msk.f32.mxu1 %vm1536_vm5, %v4910_v44  ;;  %v1505_v25 = vsel %vm1493_vm3, %v4756_v21, %v1371_v47 }
 0x20a   : > { %3509 = vmatmul.mubr.msk.f32.gmra.mxu1 %vm1536_vm5, %v4913_v34 }
 0x20b   : > { %v1411_v2 = vpop.permute.xlu0 %1410 }
 0x20c   : > { %v4929_v32 = vsel %vm1493_vm3, %v1488_v8, %v1411_v2 }
 0x20f   : > { %v1409_v4 = vpop.permute.xlu0 %1408 }
 0x210   : > { %v4926_v9 = vsel %vm1493_vm3, %v1487_v43, %v1409_v4  ;;  %v1859_v4 = vadd.f32 %v3468_v50, %v5119_v35 }
 0x211   : > { %3511 = vmatprep.mubr.msk.f32.mxu1 %vm1536_vm5, %v4926_v9 }
 0x212   : > { %3512 = vmatmul.mubr.msk.f32.gmra.mxu1 %vm1536_vm5, %v4929_v32 }
 0x213   : > { %v1369_v11 = vpop.permute.xlu0 %1368  ;;  %3520 = vmatprep.mubr.msk.f32.mxu1 %vm1536_vm5, %v4690_v6  ;;  %v502_v6 = vld [vmem:[%s5411_s7] sm:$0xff] }
 0x214   : > { %v1504_v15 = vsel %vm1493_vm3, %v4766_v48, %v1369_v11  ;;  %3622 = vmatprep.subr.mxu1 %v502_v6  ;;  %v1072_v48 = vrot.slane %v4662_v46, 7 }
 0x215   : > { %3481 = vmatprep.mubr.msk.f32.mxu0 %vm1536_vm5, %v1504_v15 }
 0x216   : > { %3482 = vmatmul.mubr.msk.f32.gmra.mxu0 %vm1536_vm5, %v1505_v25  ;;  %3521 = vmatmul.mubr.msk.f32.vlgmr.msra.gmra.mxu1 %vm1536_vm5, %v4693_v0 }
 0x217   : > { %3523 = vmatprep.mubr.msk.f32.mxu1 %vm1536_vm5, %v4714_v28  ;;  %3574 = vmatprep.mubr.msk.f32.mxu0 %vm1536_vm5, %v4714_v28  ;;  %v1287_v0 = vpop.permute.xlu0 %1286  ;;  %v1289_v28 = vpop.permute.xlu1 %1288 }
 0x218   : > { %3623 = vmatpush3.msra.mxu1 %v502_v6 }
 0x21a   : > { %3524 = vmatmul.mubr.msk.f32.gmra.mxu1 %vm1536_vm5, %v4717_v13  ;;  %3575 = vmatmul.mubr.msk.f32.vlgmr.msra.gmra.mxu0 %vm1536_vm5, %v4717_v13 }
 0x21b   : > { %3526 = vmatprep.mubr.msk.f32.mxu1 %vm1536_vm5, %v4733_v62  ;;  %3577 = vmatprep.mubr.msk.f32.mxu0 %vm1536_vm5, %v4733_v62  ;;  %v1413_v13 = vpop.permute.xlu0 %1412  ;;  %v1415_v62 = vpop.permute.xlu1 %1414 }
 0x21e   : > { %3527 = vmatmul.mubr.msk.f32.gmra.mxu1 %vm1536_vm5, %v4736_v51  ;;  %3578 = vmatmul.mubr.msk.f32.gmra.mxu0 %vm1536_vm5, %v4736_v51 }
 0x21f   : > { %3529 = vmatprep.mubr.msk.f32.mxu1 %vm1536_vm5, %v4749_v20  ;;  %3580 = vmatprep.mubr.msk.f32.mxu0 %vm1536_vm5, %v4749_v20  ;;  %v3768_v51 = vpop.permute.xlu0 %3767  ;;  %v1071_v20 = vrot.slane %v4684_v1, 7  ;;  %v3773_v21 = vpop.permute.xlu1 %3772 }
 0x220   : > { %v3774_v1 = vunpack.i.l.bf16 %v3773_v21 }
 0x221   : > { %v1073_v46 = vsel %vm1022_vm4, %v1071_v20, %v1072_v48 }
 0x222   : > { %3530 = vmatmul.mubr.msk.f32.gmra.mxu1 %vm1536_vm5, %v4752_v16  ;;  %3581 = vmatmul.mubr.msk.f32.gmra.mxu0 %vm1536_vm5, %v4752_v16  ;;  %v3769_v16 = vunpack.i.l.bf16 %v3768_v51 }
 0x223   : > { %3532 = vmatprep.mubr.msk.f32.mxu1 %vm1536_vm5, %v1504_v15  ;;  %3583 = vmatprep.mubr.msk.f32.mxu0 %vm1536_vm5, %v1504_v15 }
 0x226   : > { %3533 = vmatmul.mubr.msk.f32.gmra.mxu1 %vm1536_vm5, %v1505_v25  ;;  %3584 = vmatmul.mubr.msk.f32.gmra.mxu0 %vm1536_vm5, %v1505_v25 }
 0x227   : > { %3535 = vmatprep.mubr.msk.f32.mxu1 %vm1536_vm5, %v4778_v63  ;;  %3586 = vmatprep.mubr.msk.f32.mxu0 %vm1536_vm5, %v4778_v63  ;;  %v1129_v63 = vsel %vm1022_vm4, 0.0, %v1071_v20 }
 0x22a   : > { %3536 = vmatmul.mubr.msk.f32.gmra.mxu1 %vm1536_vm5, %v4781_v61  ;;  %3587 = vmatmul.mubr.msk.f32.gmra.mxu0 %vm1536_vm5, %v4781_v61  ;;  %v3770_v61 = vunpack.i.h.bf16 %v3768_v51 }
 0x22b   : > { %3538 = vmatprep.mubr.msk.f32.mxu1 %vm1536_vm5, %v4790_v23  ;;  %3589 = vmatprep.mubr.msk.f32.mxu0 %vm1536_vm5, %v4790_v23  ;;  %v1489_v23 = vsel %vm1456_vm2, %v1129_v63, %v1287_v0 }
 0x22e   : > { %3539 = vmatmul.mubr.msk.f32.gmra.mxu1 %vm1536_vm5, %v4803_v33  ;;  %3590 = vmatmul.mubr.msk.f32.gmra.mxu0 %vm1536_vm5, %v4803_v33  ;;  %v1491_v33 = vsel %vm1456_vm2, %v4306_v54, %v3769_v16  ;;  %v1492_v54 = vsel %vm1456_vm2, %v4293_v45, %v3770_v61 }
 0x22f   : > { %3541 = vmatprep.mubr.msk.f32.mxu1 %vm1536_vm5, %v4812_v40  ;;  %3592 = vmatprep.mubr.msk.f32.mxu0 %vm1536_vm5, %v4812_v40  ;;  %v1526_v40 = vsel %vm1493_vm3, %v1489_v23, %v1413_v13 }
 0x232   : > { %3542 = vmatmul.mubr.msk.f32.gmra.mxu1 %vm1536_vm5, %v4819_v37  ;;  %3593 = vmatmul.mubr.msk.f32.gmra.mxu0 %vm1536_vm5, %v4819_v37  ;;  %v3775_v37 = vunpack.i.h.bf16 %v3773_v21 }
 0x233   : > { %3544 = vmatprep.mubr.msk.f32.mxu1 %vm1536_vm5, %v4828_v41  ;;  %3595 = vmatprep.mubr.msk.f32.mxu0 %vm1536_vm5, %v4828_v41  ;;  %v1490_v41 = vsel %vm1456_vm2, %v1073_v46, %v1289_v28 }
 0x236   : > { %3545 = vmatmul.mubr.msk.f32.gmra.mxu1 %vm1536_vm5, %v4835_v57  ;;  %3596 = vmatmul.mubr.msk.f32.gmra.mxu0 %vm1536_vm5, %v4835_v57  ;;  %v1528_v57 = vsel %vm1493_vm3, %v1491_v33, %v3774_v1 }
 0x237   : > { %3547 = vmatprep.mubr.msk.f32.mxu1 %vm1536_vm5, %v4846_v17  ;;  %3598 = vmatprep.mubr.msk.f32.mxu0 %vm1536_vm5, %v4846_v17  ;;  %v1527_v17 = vsel %vm1493_vm3, %v1490_v41, %v1415_v62 }
 0x23a   : > { %3548 = vmatmul.mubr.msk.f32.gmra.mxu1 %vm1536_vm5, %v4851_v38  ;;  %3599 = vmatmul.mubr.msk.f32.gmra.mxu0 %vm1536_vm5, %v4851_v38  ;;  %v1529_v38 = vsel %vm1493_vm3, %v1492_v54, %v3775_v37 }
 0x23b   : > { %3550 = vmatprep.mubr.msk.f32.mxu1 %vm1536_vm5, %v4862_v42  ;;  %3601 = vmatprep.mubr.msk.f32.mxu0 %vm1536_vm5, %v4862_v42 }
 0x23e   : > { %3551 = vmatmul.mubr.msk.f32.gmra.mxu1 %vm1536_vm5, %v4865_v59  ;;  %3602 = vmatmul.mubr.msk.f32.gmra.mxu0 %vm1536_vm5, %v4865_v59 }
 0x23f   : > { %3553 = vmatprep.mubr.msk.f32.mxu1 %vm1536_vm5, %v4878_v24  ;;  %3604 = vmatprep.mubr.msk.f32.mxu0 %vm1536_vm5, %v4878_v24 }
 0x242   : > { %3554 = vmatmul.mubr.msk.f32.gmra.mxu1 %vm1536_vm5, %v4881_v31  ;;  %3605 = vmatmul.mubr.msk.f32.gmra.mxu0 %vm1536_vm5, %v4881_v31  ;;  %v1699_v31 = vpop.f32.mrf.mxu0 }
 0x243   : > { %3556 = vmatprep.mubr.msk.f32.mxu1 %vm1536_vm5, %v4894_v12  ;;  %3607 = vmatprep.mubr.msk.f32.mxu0 %vm1536_vm5, %v4894_v12 }
 0x246   : > { %3557 = vmatmul.mubr.msk.f32.gmra.mxu1 %vm1536_vm5, %v4897_v14  ;;  %3608 = vmatmul.mubr.msk.f32.gmra.mxu0 %vm1536_vm5, %v4897_v14 }
 0x247   : > { %3559 = vmatprep.mubr.msk.f32.mxu1 %vm1536_vm5, %v4910_v44  ;;  %3610 = vmatprep.mubr.msk.f32.mxu0 %vm1536_vm5, %v4910_v44 }
 0x24a   : > { %3560 = vmatmul.mubr.msk.f32.gmra.mxu1 %vm1536_vm5, %v4913_v34  ;;  %3611 = vmatmul.mubr.msk.f32.gmra.mxu0 %vm1536_vm5, %v4913_v34 }
 0x24b   : > { %3562 = vmatprep.mubr.msk.f32.mxu1 %vm1536_vm5, %v4926_v9  ;;  %3613 = vmatprep.mubr.msk.f32.mxu0 %vm1536_vm5, %v4926_v9 }
 0x24e   : > { %3563 = vmatmul.mubr.msk.f32.gmra.mxu1 %vm1536_vm5, %v4929_v32  ;;  %3614 = vmatmul.mubr.msk.f32.gmra.mxu0 %vm1536_vm5, %v4929_v32  ;;  %v1858_v32 = vadd.f32 %v5119_v35, %v1699_v31 }
 0x24f   : > { %3565 = vmatprep.mubr.msk.f32.mxu1 %vm1536_vm5, %v1526_v40  ;;  %3616 = vmatprep.mubr.msk.f32.mxu0 %vm1536_vm5, %v1526_v40 }
 0x252   : > { %3566 = vmatmul.mubr.msk.f32.gmra.mxu1 %vm1536_vm5, %v1527_v17  ;;  %3617 = vmatmul.mubr.msk.f32.gmra.mxu0 %vm1536_vm5, %v1527_v17 }
 0x253   : > { %3619 = vmatprep.mubr.msk.f32.mxu0 %vm1536_vm5, %v1528_v57 }
 0x256   : > { %3620 = vmatmul.mubr.msk.f32.gmra.mxu0 %vm1536_vm5, %v1529_v38 }
 0x262   : > { %v3471_v55 = vpop.f32.mrf.mxu0 }
 0x263   : > { %v1861_v6 = vadd.f32 %v3471_v55, %v5119_v35 }
 0x264   : > { %v1709_v52 = vpop.f32.mrf.mxu0 }
 0x265   : > { %v1860_v62 = vadd.f32 %v5119_v35, %v1709_v52 }
 0x26a   : > { %v3474_v60 = vpop.f32.mrf.mxu0 }
 0x26b   : > { %v1863_v61 = vadd.f32 %v3474_v60, %v5119_v35 }
 0x26c   : > { %v1719_v14 = vpop.f32.mrf.mxu0 }
 0x26d   : > { %v1862_v46 = vadd.f32 %v5119_v35, %v1719_v14 }
 0x272   : > { %v3477_v30 = vpop.f32.mrf.mxu0 }
 0x273   : > { %v1865_v50 = vadd.f32 %v3477_v30, %v5119_v35 }
 0x274   : > { %v1729_v36 = vpop.f32.mrf.mxu0 }
 0x27a   : > { %v3480_v5 = vpop.f32.mrf.mxu0 }
 0x27c   : > { %v1739_v34 = vpop.f32.mrf.mxu0 }
 0x28b   : > { %v5076_v42 = vpop.f32.mrf.mxu1 }
 0x28d   : > { %v5078_v59 = vpop.f32.mrf.mxu1 }
 0x28f   : > { %v5080_v22 = vpop.f32.mrf.mxu1 }
 0x291   : > { %v5082_v45 = vpop.f32.mrf.mxu1 }
 0x296   : > { %v5084_v58 = vpop.f32.mrf.mxu1 }
 0x298   : > { %v5086_v18 = vpop.f32.mrf.mxu1 }
 0x29e   : > { %v5088_v56 = vpop.f32.mrf.mxu1 }
 0x2a0   : > { %v5090_v7 = vpop.f32.mrf.mxu1 }
 0x2a6   : > { %v5092_v10 = vpop.f32.mrf.mxu1 }
 0x2a8   : > { %v5094_v24 = vpop.f32.mrf.mxu1 }
 0x2b2   : > { %v5096_v29 = vpop.f32.mrf.mxu1 }
 0x2b4   : > { %v5098_v19 = vpop.f32.mrf.mxu1 }
 0x2ba   : > { %v5100_v53 = vpop.f32.mrf.mxu1 }
 0x2bc   : > { %v5102_v3 = vpop.f32.mrf.mxu1 }
 0x2c2   : > { %v5104_v12 = vpop.f32.mrf.mxu1 }
 0x2c4   : > { %v5106_v49 = vpop.f32.mrf.mxu1 }
 0x2ca   : > { %v5108_v27 = vpop.f32.mrf.mxu1 }
 0x2cc   : > { %v5110_v26 = vpop.f32.mrf.mxu1 }
 0x2d2   : > { %v5112_v44 = vpop.f32.mrf.mxu1 }
 0x2d4   : > { %v5114_v2 = vpop.f32.mrf.mxu1 }
 0x2d6   : > { %v5121_v39 = vpop.f32.mrf.mxu0  ;;  %v3522_v43 = vpop.f32.mrf.mxu1 }
 0x2d7   : > { %v2122_v47 = vadd.f32 %v3522_v43, %v1859_v4  ;;  %v1864_v43 = vadd.f32 %v5119_v35, %v1729_v36 }
 0x2d8   : > { %v5124_v8 = vpop.f32.mrf.mxu0  ;;  %v1962_v9 = vpop.f32.mrf.mxu1 }
 0x2d9   : > { %v2121_v25 = vadd.f32 %v1962_v9, %v1858_v32 }
 0x2da   : > { %v3525_v11 = vpop.f32.mrf.mxu1  ;;  %v3576_v15 = vpop.f32.mrf.mxu0 }
 0x2db   : > { %v2385_v0 = vadd.f32 %v3576_v15, %v2122_v47  ;;  %v2124_v20 = vadd.f32 %v3525_v11, %v1861_v6  ;;  %v1867_v15 = vadd.f32 %v3480_v5, %v5119_v35 }
 0x2dc   : > { %v1972_v28 = vpop.f32.mrf.mxu1  ;;  %v2225_v13 = vpop.f32.mrf.mxu0 }
 0x2dd   : > { %v2384_v51 = vadd.f32 %v2225_v13, %v2121_v25  ;;  %v2123_v48 = vadd.f32 %v1972_v28, %v1860_v62  ;;  %v2417_v1 = vmax.f32 %v2385_v0, 0.0  ;;  %v1866_v28 = vadd.f32 %v5119_v35, %v1739_v34 }
 0x2de   : > { %v3528_v16 = vpop.f32.mrf.mxu1  ;;  %v3579_v21 = vpop.f32.mrf.mxu0  ;;  %v1868_v34 = vadd.f32 %v5119_v35, %v5124_v8  ;;  %v1870_v8 = vadd.f32 %v5119_v35, %v5078_v59  ;;  %v1872_v59 = vadd.f32 %v5119_v35, %v5082_v45  ;;  %v1874_v45 = vadd.f32 %v5119_v35, %v5086_v18 }
 0x2df   : > { %v2416_v63 = vmax.f32 %v2384_v51, 0.0  ;;  %v2387_v23 = vadd.f32 %v3579_v21, %v2124_v20  ;;  %v2126_v41 = vadd.f32 %v3528_v16, %v1863_v61  ;;  %v1869_v21 = vadd.f32 %v5121_v39, %v5119_v35 }
 0x2e0   : > { %v1982_v33 = vpop.f32.mrf.mxu1  ;;  %v2235_v40 = vpop.f32.mrf.mxu0  ;;  %v1871_v39 = vadd.f32 %v5076_v42, %v5119_v35  ;;  %v1873_v42 = vadd.f32 %v5080_v22, %v5119_v35  ;;  %v1875_v22 = vadd.f32 %v5084_v58, %v5119_v35  ;;  %v1877_v58 = vadd.f32 %v5088_v56, %v5119_v35 }
 0x2e1   : > { %v2386_v37 = vadd.f32 %v2235_v40, %v2123_v48  ;;  %3624 = vmatprep.mubr.msk.f32.mxu1 %vm1456_vm2, %v2416_v63  ;;  %v2125_v17 = vadd.f32 %v1982_v33, %v1862_v46  ;;  %v2419_v31 = vmax.f32 %v2387_v23, 0.0  ;;  %v1876_v18 = vadd.f32 %v5119_v35, %v5090_v7 }
 0x2e2   : > { %v3531_v54 = vpop.f32.mrf.mxu1  ;;  %v3582_v57 = vpop.f32.mrf.mxu0  ;;  %3625 = vmatmul.mubr.msk.f32.vlgmr.msra.gmra.mxu1 %vm1456_vm2, %v2417_v1  ;;  %v1879_v56 = vadd.f32 %v5092_v10, %v5119_v35  ;;  %v1878_v7 = vadd.f32 %v5119_v35, %v5094_v24  ;;  %v1881_v10 = vadd.f32 %v5096_v29, %v5119_v35  ;;  %v1880_v24 = vadd.f32 %v5119_v35, %v5098_v19 }
 0x2e3   : > { %v2418_v38 = vmax.f32 %v2386_v37, 0.0  ;;  %v2389_v55 = vadd.f32 %v3582_v57, %v2126_v41  ;;  %v2128_v14 = vadd.f32 %v3531_v54, %v1865_v50  ;;  %v1883_v29 = vadd.f32 %v5100_v53, %v5119_v35 }
 0x2e4   : > { %v1992_v52 = vpop.f32.mrf.mxu1  ;;  %v2245_v60 = vpop.f32.mrf.mxu0  ;;  %v1882_v19 = vadd.f32 %v5119_v35, %v5102_v3  ;;  %v1885_v53 = vadd.f32 %v5104_v12, %v5119_v35  ;;  %v1884_v3 = vadd.f32 %v5119_v35, %v5106_v49  ;;  %v1887_v12 = vadd.f32 %v5108_v27, %v5119_v35 }
 0x2e5   : > { %v2388_v4 = vadd.f32 %v2245_v60, %v2125_v17  ;;  %3627 = vmatprep.mubr.msk.f32.mxu1 %vm1456_vm2, %v2418_v38  ;;  %v2127_v47 = vadd.f32 %v1992_v52, %v1864_v43  ;;  %v2421_v25 = vmax.f32 %v2389_v55, 0.0  ;;  %v1886_v49 = vadd.f32 %v5119_v35, %v5110_v26 }
 0x2e6   : > { %v3534_v9 = vpop.f32.mrf.mxu1  ;;  %v3585_v32 = vpop.f32.mrf.mxu0  ;;  %3628 = vmatmul.mubr.msk.f32.gmra.mxu1 %vm1456_vm2, %v2419_v31  ;;  %v1889_v27 = vadd.f32 %v5112_v44, %v5119_v35  ;;  %v1888_v26 = vadd.f32 %v5119_v35, %v5114_v2 }
 0x2e7   : > { %v2420_v11 = vmax.f32 %v2388_v4, 0.0  ;;  %v2391_v30 = vadd.f32 %v3585_v32, %v2128_v14  ;;  %v2130_v36 = vadd.f32 %v3534_v9, %v1867_v15 }
 0x2e8   : > { %v2002_v6 = vpop.f32.mrf.mxu1  ;;  %v2255_v0 = vpop.f32.mrf.mxu0 }
 0x2e9   : > { %v2390_v13 = vadd.f32 %v2255_v0, %v2127_v47  ;;  %3630 = vmatprep.mubr.msk.f32.mxu1 %vm1456_vm2, %v2420_v11  ;;  %v2129_v20 = vadd.f32 %v2002_v6, %v1866_v28  ;;  %v2423_v5 = vmax.f32 %v2391_v30, 0.0 }
 0x2ea   : > { %v3537_v62 = vpop.f32.mrf.mxu1  ;;  %v3588_v51 = vpop.f32.mrf.mxu0  ;;  %3631 = vmatmul.mubr.msk.f32.gmra.mxu1 %vm1456_vm2, %v2421_v25 }
 0x2eb   : > { %v2422_v16 = vmax.f32 %v2390_v13, 0.0  ;;  %v2393_v48 = vadd.f32 %v3588_v51, %v2130_v36  ;;  %v2132_v23 = vadd.f32 %v3537_v62, %v1869_v21 }
 0x2ec   : > { %v2012_v63 = vpop.f32.mrf.mxu1  ;;  %v2265_v61 = vpop.f32.mrf.mxu0 }
 0x2ed   : > { %v2392_v1 = vadd.f32 %v2265_v61, %v2129_v20  ;;  %3633 = vmatprep.mubr.msk.f32.mxu1 %vm1456_vm2, %v2422_v16  ;;  %v2131_v46 = vadd.f32 %v2012_v63, %v1868_v34  ;;  %v2425_v41 = vmax.f32 %v2393_v48, 0.0 }
 0x2ee   : > { %v3540_v33 = vpop.f32.mrf.mxu1  ;;  %v3591_v40 = vpop.f32.mrf.mxu0  ;;  %3634 = vmatmul.mubr.msk.f32.gmra.mxu1 %vm1456_vm2, %v2423_v5 }
 0x2ef   : > { %v2424_v37 = vmax.f32 %v2392_v1, 0.0  ;;  %v2395_v54 = vadd.f32 %v3591_v40, %v2132_v23  ;;  %v2134_v50 = vadd.f32 %v3540_v33, %v1871_v39 }
 0x2f0   : > { %v2022_v57 = vpop.f32.mrf.mxu1  ;;  %v2275_v17 = vpop.f32.mrf.mxu0 }
 0x2f1   : > { %v2394_v38 = vadd.f32 %v2275_v17, %v2131_v46  ;;  %3636 = vmatprep.mubr.msk.f32.mxu1 %vm1456_vm2, %v2424_v37  ;;  %v2133_v52 = vadd.f32 %v2022_v57, %v1870_v8  ;;  %v2427_v43 = vmax.f32 %v2395_v54, 0.0 }
 0x2f2   : > { %v3543_v31 = vpop.f32.mrf.mxu1  ;;  %v3594_v55 = vpop.f32.mrf.mxu0  ;;  %3637 = vmatmul.mubr.msk.f32.gmra.mxu1 %vm1456_vm2, %v2425_v41 }
 0x2f3   : > { %v2426_v60 = vmax.f32 %v2394_v38, 0.0  ;;  %v2397_v4 = vadd.f32 %v3594_v55, %v2134_v50  ;;  %v2136_v47 = vadd.f32 %v3543_v31, %v1873_v42 }
 0x2f4   : > { %v2032_v14 = vpop.f32.mrf.mxu1  ;;  %v2285_v9 = vpop.f32.mrf.mxu0 }
 0x2f5   : > { %v2396_v32 = vadd.f32 %v2285_v9, %v2133_v52  ;;  %3639 = vmatprep.mubr.msk.f32.mxu1 %vm1456_vm2, %v2426_v60  ;;  %v2135_v25 = vadd.f32 %v2032_v14, %v1872_v59  ;;  %v2429_v6 = vmax.f32 %v2397_v4, 0.0 }
 0x2f6   : > { %v3546_v11 = vpop.f32.mrf.mxu1  ;;  %v3597_v15 = vpop.f32.mrf.mxu0  ;;  %3640 = vmatmul.mubr.msk.f32.gmra.mxu1 %vm1456_vm2, %v2427_v43 }
 0x2f7   : > { %v2428_v30 = vmax.f32 %v2396_v32, 0.0  ;;  %v2399_v0 = vadd.f32 %v3597_v15, %v2136_v47  ;;  %v2138_v62 = vadd.f32 %v3546_v11, %v1875_v22 }
 0x2f8   : > { %v2042_v28 = vpop.f32.mrf.mxu1  ;;  %v2295_v13 = vpop.f32.mrf.mxu0 }
 0x2f9   : > { %v2398_v36 = vadd.f32 %v2295_v13, %v2135_v25  ;;  %3642 = vmatprep.mubr.msk.f32.mxu1 %vm1456_vm2, %v2428_v30  ;;  %v2137_v16 = vadd.f32 %v2042_v28, %v1874_v45  ;;  %v2431_v5 = vmax.f32 %v2399_v0, 0.0 }
 0x2fa   : > { %v3549_v51 = vpop.f32.mrf.mxu1  ;;  %v3600_v20 = vpop.f32.mrf.mxu0  ;;  %3643 = vmatmul.mubr.msk.f32.gmra.mxu1 %vm1456_vm2, %v2429_v6 }
 0x2fb   : > { %v2430_v21 = vmax.f32 %v2398_v36, 0.0  ;;  %v2401_v48 = vadd.f32 %v3600_v20, %v2138_v62  ;;  %v2140_v1 = vadd.f32 %v3549_v51, %v1877_v58 }
 0x2fc   : > { %v2052_v63 = vpop.f32.mrf.mxu1  ;;  %v2305_v61 = vpop.f32.mrf.mxu0 }
 0x2fd   : > { %v2400_v34 = vadd.f32 %v2305_v61, %v2137_v16  ;;  %3645 = vmatprep.mubr.msk.f32.mxu1 %vm1456_vm2, %v2430_v21  ;;  %v2139_v40 = vadd.f32 %v2052_v63, %v1876_v18  ;;  %v2433_v37 = vmax.f32 %v2401_v48, 0.0 }
 0x2fe   : > { %v3552_v23 = vpop.f32.mrf.mxu1  ;;  %v3603_v33 = vpop.f32.mrf.mxu0  ;;  %3646 = vmatmul.mubr.msk.f32.gmra.mxu1 %vm1456_vm2, %v2431_v5 }
 0x2ff   : > { %v2432_v46 = vmax.f32 %v2400_v34, 0.0  ;;  %v2403_v39 = vadd.f32 %v3603_v33, %v2140_v1  ;;  %v2142_v17 = vadd.f32 %v3552_v23, %v1879_v56 }
 0x300   : > { %v2062_v41 = vpop.f32.mrf.mxu1  ;;  %v2315_v54 = vpop.f32.mrf.mxu0 }
 0x301   : > { %v2402_v57 = vadd.f32 %v2315_v54, %v2139_v40  ;;  %3648 = vmatprep.mubr.msk.f32.mxu1 %vm1456_vm2, %v2432_v46  ;;  %v2141_v50 = vadd.f32 %v2062_v41, %v1878_v7  ;;  %v2435_v55 = vmax.f32 %v2403_v39, 0.0 }
 0x302   : > { %v3555_v8 = vpop.f32.mrf.mxu1  ;;  %v3606_v38 = vpop.f32.mrf.mxu0  ;;  %3649 = vmatmul.mubr.msk.f32.gmra.mxu1 %vm1456_vm2, %v2433_v37 }
 0x303   : > { %v2434_v31 = vmax.f32 %v2402_v57, 0.0  ;;  %v2405_v52 = vadd.f32 %v3606_v38, %v2142_v17  ;;  %v2144_v4 = vadd.f32 %v3555_v8, %v1881_v10 }
 0x304   : > { %v2072_v60 = vpop.f32.mrf.mxu1  ;;  %v2325_v42 = vpop.f32.mrf.mxu0 }
 0x305   : > { %v2404_v43 = vadd.f32 %v2325_v42, %v2141_v50  ;;  %3651 = vmatprep.mubr.msk.f32.mxu1 %vm1456_vm2, %v2434_v31  ;;  %v2143_v59 = vadd.f32 %v2072_v60, %v1880_v24  ;;  %v2437_v47 = vmax.f32 %v2405_v52, 0.0  ;;  %v3776_v24 = vld [vmem:[%s4197_s19 + $0x8] sm:$0xff] }
 0x306   : > { %v3558_v14 = vpop.f32.mrf.mxu1  ;;  %v3609_v9 = vpop.f32.mrf.mxu0  ;;  %3652 = vmatmul.mubr.msk.f32.gmra.mxu1 %vm1456_vm2, %v2435_v55  ;;  %v5214_v55 = vld [vmem:[%s5412_s8] ss:$0 sm:$0xff] }
 0x307   : > { %v2436_v32 = vmax.f32 %v2404_v43, 0.0  ;;  %v2407_v11 = vadd.f32 %v3609_v9, %v2144_v4  ;;  %v2146_v22 = vadd.f32 %v3558_v14, %v1883_v29 }
 0x308   : > { %v2082_v15 = vpop.f32.mrf.mxu1  ;;  %v2335_v25 = vpop.f32.mrf.mxu0 }
 0x309   : > { %v2406_v30 = vadd.f32 %v2335_v25, %v2143_v59  ;;  %3654 = vmatprep.mubr.msk.f32.mxu1 %vm1456_vm2, %v2436_v32  ;;  %v2145_v28 = vadd.f32 %v2082_v15, %v1882_v19  ;;  %v2439_v45 = vmax.f32 %v2407_v11, 0.0  ;;  %v3777_v59 = vld [vmem:[%s4197_s19] sm:$0xff]  ;;  %v3778_v15 = vld [vmem:[%s4197_s19 + $0x18] sm:$0xff] }
 0x30a   : > { %v3561_v6 = vpop.f32.mrf.mxu1  ;;  %v3612_v0 = vpop.f32.mrf.mxu0  ;;  %3655 = vmatmul.mubr.msk.f32.gmra.mxu1 %vm1456_vm2, %v2437_v47 }
 0x30b   : > { %v2438_v13 = vmax.f32 %v2406_v30, 0.0  ;;  %v2409_v36 = vadd.f32 %v3612_v0, %v2146_v22  ;;  %v2148_v16 = vadd.f32 %v3561_v6, %v1885_v53  ;;  %v3779_v6 = vld [vmem:[%s4197_s19 + $0x10] sm:$0xff] }
 0x30c   : > { %v2092_v62 = vpop.f32.mrf.mxu1  ;;  %v2345_v51 = vpop.f32.mrf.mxu0 }
 0x30d   : > { %v2408_v20 = vadd.f32 %v2345_v51, %v2145_v28  ;;  %3657 = vmatprep.mubr.msk.f32.mxu1 %vm1456_vm2, %v2438_v13  ;;  %v2147_v5 = vadd.f32 %v2092_v62, %v1884_v3  ;;  %v2441_v63 = vmax.f32 %v2409_v36, 0.0 }
 0x30e   : > { %v3564_v21 = vpop.f32.mrf.mxu1  ;;  %v3615_v58 = vpop.f32.mrf.mxu0  ;;  %3658 = vmatmul.mubr.msk.f32.gmra.mxu1 %vm1456_vm2, %v2439_v45  ;;  %v3780_v45 = vld [vmem:[%s4197_s19 + $0x28] sm:$0xff] }
 0x30f   : > { %v2440_v48 = vmax.f32 %v2408_v20, 0.0  ;;  %v2411_v61 = vadd.f32 %v3615_v58, %v2148_v16  ;;  %v2150_v23 = vadd.f32 %v3564_v21, %v1887_v12  ;;  %v3781_v20 = vld [vmem:[%s4197_s19 + $0x20] sm:$0xff] }
 0x310   : > { %v2102_v18 = vpop.f32.mrf.mxu1  ;;  %v2355_v34 = vpop.f32.mrf.mxu0 }
 0x311   : > { %v2410_v1 = vadd.f32 %v2355_v34, %v2147_v5  ;;  %3660 = vmatprep.mubr.msk.f32.mxu1 %vm1456_vm2, %v2440_v48  ;;  %v2149_v46 = vadd.f32 %v2102_v18, %v1886_v49  ;;  %v2443_v37 = vmax.f32 %v2411_v61, 0.0  ;;  %v3782_v48 = vld [vmem:[%s4197_s19 + $0x38] sm:$0xff]  ;;  %v3783_v34 = vld [vmem:[%s4197_s19 + $0x30] sm:$0xff] }
 0x312   : > { %v3567_v33 = vpop.f32.mrf.mxu1  ;;  %v3618_v40 = vpop.f32.mrf.mxu0  ;;  %3661 = vmatmul.mubr.msk.f32.gmra.mxu1 %vm1456_vm2, %v2441_v63 }
 0x313   : > { %v2442_v56 = vmax.f32 %v2410_v1, 0.0  ;;  %v2413_v39 = vadd.f32 %v3618_v40, %v2150_v23  ;;  %v2152_v57 = vadd.f32 %v3567_v33, %v1889_v27  ;;  %v3784_v40 = vld [vmem:[%s4197_s19 + $0x48] sm:$0xff] }
 0x314   : > { %v2112_v41 = vpop.f32.mrf.mxu1  ;;  %v2365_v54 = vpop.f32.mrf.mxu0 }
 0x315   : > { %v2412_v7 = vadd.f32 %v2365_v54, %v2149_v46  ;;  %3663 = vmatprep.mubr.msk.f32.mxu1 %vm1456_vm2, %v2442_v56  ;;  %v2151_v8 = vadd.f32 %v2112_v41, %v1888_v26  ;;  %v2445_v50 = vmax.f32 %v2413_v39, 0.0  ;;  %v3785_v39 = vld [vmem:[%s4197_s19 + $0x40] sm:$0xff] }
 0x316   : > { %v3621_v17 = vpop.f32.mrf.mxu0  ;;  %3664 = vmatmul.mubr.msk.f32.gmra.mxu1 %vm1456_vm2, %v2443_v37 }
 0x317   : > { %v2444_v38 = vmax.f32 %v2412_v7, 0.0  ;;  %v2415_v31 = vadd.f32 %v3621_v17, %v2152_v57  ;;  %v3786_v57 = vld [vmem:[%s4197_s19 + $0x58] sm:$0xff] }
 0x318   : > { %v2375_v44 = vpop.f32.mrf.mxu0 }
 0x319   : > { %v2414_v10 = vadd.f32 %v2375_v44, %v2151_v8  ;;  %3666 = vmatprep.mubr.msk.f32.mxu1 %vm1456_vm2, %v2444_v38  ;;  %v2447_v35 = vmax.f32 %v2415_v31, 0.0  ;;  %v3787_v31 = vld [vmem:[%s4197_s19 + $0x50] sm:$0xff] }
 0x31a   : > { %3667 = vmatmul.mubr.msk.f32.gmra.mxu1 %vm1456_vm2, %v2445_v50 }
 0x31b   : > { %v2446_v2 = vmax.f32 %v2414_v10, 0.0 }
 0x31d   : > { %3669 = vmatprep.mubr.msk.f32.mxu1 %vm1456_vm2, %v2446_v2 }
 0x31e   : > { %3670 = vmatmul.mubr.msk.f32.gmra.mxu1 %vm1456_vm2, %v2447_v35 }
 0x3a2   : > { %v3626_v52 = vpop.f32.mrf.mxu1 }
 0x3a3   : > { %v2622_v60 = vadd.f32 %v3626_v52, %v5214_v55  ;;  %v3788_v52 = vld [vmem:[%s4197_s19 + $0x68] sm:$0xff] }
 0x3a4   : > { %v2616_v42 = vpop.f32.mrf.mxu1 }
 0x3a5   : > { %v2776_v43 = vadd.f32 %v3776_v24, %v2622_v60  ;;  %v2617_v4 = vadd.f32 %v5214_v55, %v2616_v42 }
 0x3a6   : > { %v3629_v14 = vpop.f32.mrf.mxu1 }
 0x3a7   : > { %v2808_v9 = vmax.f32 %v2776_v43, 0.0  ;;  %v2775_v32 = vadd.f32 %v3777_v59, %v2617_v4  ;;  %v2632_v29 = vadd.f32 %v3629_v14, %v5214_v55  ;;  %v3789_v4 = vld [vmem:[%s4197_s19 + $0x60] sm:$0xff] }
 0x3a8   : > { %v2626_v47 = vpop.f32.mrf.mxu1 }
 0x3a9   : > { %2840 = vst.msk [vmem:[%s5223_s15 + $0x8] sm:$0xff] %vm548_vm0, %v2808_v9  ;;  %v2807_v11 = vmax.f32 %v2775_v32, 0.0  ;;  %v2778_v25 = vadd.f32 %v3778_v15, %v2632_v29  ;;  %v2627_v19 = vadd.f32 %v5214_v55, %v2626_v47  ;;  %v3790_v29 = vld [vmem:[%s4197_s19 + $0x78] sm:$0xff] }
 0x3aa   : > { %v3632_v30 = vpop.f32.mrf.mxu1 }
 0x3ab   : > { %2839 = vst.msk [vmem:[%s5223_s15] sm:$0xff] %vm548_vm0, %v2807_v11  ;;  %v2810_v22 = vmax.f32 %v2778_v25, 0.0  ;;  %v2777_v0 = vadd.f32 %v3779_v6, %v2627_v19  ;;  %v2642_v28 = vadd.f32 %v3632_v30, %v5214_v55  ;;  %v3791_v19 = vld [vmem:[%s4197_s19 + $0x70] sm:$0xff] }
 0x3ac   : > { %v2636_v13 = vpop.f32.mrf.mxu1 }
 0x3ad   : > { %2842 = vst.msk [vmem:[%s5223_s15 + $0x18] sm:$0xff] %vm548_vm0, %v2810_v22  ;;  %v2809_v53 = vmax.f32 %v2777_v0, 0.0  ;;  %v2780_v36 = vadd.f32 %v3780_v45, %v2642_v28  ;;  %v2637_v62 = vadd.f32 %v5214_v55, %v2636_v13  ;;  %v3792_v28 = vld [vmem:[%s4197_s19 + $0x88] sm:$0xff] }
 0x3ae   : > { %v3635_v51 = vpop.f32.mrf.mxu1 }
 0x3af   : > { %2841 = vst.msk [vmem:[%s5223_s15 + $0x10] sm:$0xff] %vm548_vm0, %v2809_v53  ;;  %v2812_v3 = vmax.f32 %v2780_v36, 0.0  ;;  %v2779_v16 = vadd.f32 %v3781_v20, %v2637_v62  ;;  %v2652_v21 = vadd.f32 %v3635_v51, %v5214_v55  ;;  %v3793_v62 = vld [vmem:[%s4197_s19 + $0x80] sm:$0xff] }
 0x3b0   : > { %v2646_v58 = vpop.f32.mrf.mxu1 }
 0x3b1   : > { %2844 = vst.msk [vmem:[%s5223_s15 + $0x28] sm:$0xff] %vm548_vm0, %v2812_v3  ;;  %v2811_v5 = vmax.f32 %v2779_v16, 0.0  ;;  %v2782_v12 = vadd.f32 %v3782_v48, %v2652_v21  ;;  %v2647_v63 = vadd.f32 %v5214_v55, %v2646_v58  ;;  %v3794_v21 = vld [vmem:[%s4197_s19 + $0x98] sm:$0xff] }
 0x3b2   : > { %v3638_v61 = vpop.f32.mrf.mxu1 }
 0x3b3   : > { %2843 = vst.msk [vmem:[%s5223_s15 + $0x20] sm:$0xff] %vm548_vm0, %v2811_v5  ;;  %v2814_v18 = vmax.f32 %v2782_v12, 0.0  ;;  %v2781_v49 = vadd.f32 %v3783_v34, %v2647_v63  ;;  %v2662_v1 = vadd.f32 %v3638_v61, %v5214_v55  ;;  %v3795_v63 = vld [vmem:[%s4197_s19 + $0x90] sm:$0xff] }
 0x3b4   : > { %v2656_v23 = vpop.f32.mrf.mxu1 }
 0x3b5   : > { %2846 = vst.msk [vmem:[%s5223_s15 + $0x38] sm:$0xff] %vm548_vm0, %v2814_v18  ;;  %v2813_v33 = vmax.f32 %v2781_v49, 0.0  ;;  %v2784_v46 = vadd.f32 %v3784_v40, %v2662_v1  ;;  %v2657_v56 = vadd.f32 %v5214_v55, %v2656_v23  ;;  %v3796_v1 = vld [vmem:[%s4197_s19 + $0xa8] sm:$0xff] }
 0x3b6   : > { %v3641_v27 = vpop.f32.mrf.mxu1 }
 0x3b7   : > { %2845 = vst.msk [vmem:[%s5223_s15 + $0x30] sm:$0xff] %vm548_vm0, %v2813_v33  ;;  %v2816_v37 = vmax.f32 %v2784_v46, 0.0  ;;  %v2783_v41 = vadd.f32 %v3785_v39, %v2657_v56  ;;  %v2672_v54 = vadd.f32 %v3641_v27, %v5214_v55  ;;  %v3797_v56 = vld [vmem:[%s4197_s19 + $0xa0] sm:$0xff] }
 0x3b8   : > { %v2666_v26 = vpop.f32.mrf.mxu1 }
 0x3b9   : > { %2848 = vst.msk [vmem:[%s5223_s15 + $0x48] sm:$0xff] %vm548_vm0, %v2816_v37  ;;  %v2815_v7 = vmax.f32 %v2783_v41, 0.0  ;;  %v2786_v17 = vadd.f32 %v3786_v57, %v2672_v54  ;;  %v2667_v8 = vadd.f32 %v5214_v55, %v2666_v26  ;;  %v3798_v54 = vld [vmem:[%s4197_s19 + $0xb8] sm:$0xff] }
 0x3ba   : > { %v3644_v38 = vpop.f32.mrf.mxu1 }
 0x3bb   : > { %2847 = vst.msk [vmem:[%s5223_s15 + $0x40] sm:$0xff] %vm548_vm0, %v2815_v7  ;;  %v2818_v50 = vmax.f32 %v2786_v17, 0.0  ;;  %v2785_v44 = vadd.f32 %v3787_v31, %v2667_v8  ;;  %v2682_v10 = vadd.f32 %v3644_v38, %v5214_v55  ;;  %v3799_v8 = vld [vmem:[%s4197_s19 + $0xb0] sm:$0xff] }
 0x3bc   : > { %v2676_v2 = vpop.f32.mrf.mxu1 }
 0x3bd   : > { %2850 = vst.msk [vmem:[%s5223_s15 + $0x58] sm:$0xff] %vm548_vm0, %v2818_v50  ;;  %v2817_v35 = vmax.f32 %v2785_v44, 0.0  ;;  %v2788_v60 = vadd.f32 %v3788_v52, %v2682_v10  ;;  %v2677_v42 = vadd.f32 %v5214_v55, %v2676_v2  ;;  %v3800_v10 = vld [vmem:[%s4197_s19 + $0xc8] sm:$0xff] }
 0x3be   : > { %v3647_v24 = vpop.f32.mrf.mxu1 }
 0x3bf   : > { %2849 = vst.msk [vmem:[%s5223_s15 + $0x50] sm:$0xff] %vm548_vm0, %v2817_v35  ;;  %v2820_v43 = vmax.f32 %v2788_v60, 0.0  ;;  %v2787_v14 = vadd.f32 %v3789_v4, %v2677_v42  ;;  %v2692_v9 = vadd.f32 %v3647_v24, %v5214_v55  ;;  %v3801_v42 = vld [vmem:[%s4197_s19 + $0xc0] sm:$0xff] }
 0x3c0   : > { %v2686_v59 = vpop.f32.mrf.mxu1 }
 0x3c1   : > { %2852 = vst.msk [vmem:[%s5223_s15 + $0x68] sm:$0xff] %vm548_vm0, %v2820_v43  ;;  %v2819_v32 = vmax.f32 %v2787_v14, 0.0  ;;  %v2790_v47 = vadd.f32 %v3790_v29, %v2692_v9  ;;  %v2687_v11 = vadd.f32 %v5214_v55, %v2686_v59  ;;  %v3802_v9 = vld [vmem:[%s4197_s19 + $0xd8] sm:$0xff] }
 0x3c2   : > { %v3650_v15 = vpop.f32.mrf.mxu1 }
 0x3c3   : > { %2851 = vst.msk [vmem:[%s5223_s15 + $0x60] sm:$0xff] %vm548_vm0, %v2819_v32  ;;  %v2822_v25 = vmax.f32 %v2790_v47, 0.0  ;;  %v2789_v30 = vadd.f32 %v3791_v19, %v2687_v11  ;;  %v2702_v22 = vadd.f32 %v3650_v15, %v5214_v55  ;;  %v3803_v11 = vld [vmem:[%s4197_s19 + $0xd0] sm:$0xff] }
 0x3c4   : > { %v2696_v6 = vpop.f32.mrf.mxu1 }
 0x3c5   : > { %2854 = vst.msk [vmem:[%s5223_s15 + $0x78] sm:$0xff] %vm548_vm0, %v2822_v25  ;;  %v2821_v0 = vmax.f32 %v2789_v30, 0.0  ;;  %v2792_v13 = vadd.f32 %v3792_v28, %v2702_v22  ;;  %v2697_v53 = vadd.f32 %v5214_v55, %v2696_v6  ;;  %v3804_v22 = vld [vmem:[%s4197_s19 + $0xe8] sm:$0xff] }
 0x3c6   : > { %v3653_v45 = vpop.f32.mrf.mxu1 }
 0x3c7   : > { %2853 = vst.msk [vmem:[%s5223_s15 + $0x70] sm:$0xff] %vm548_vm0, %v2821_v0  ;;  %v2824_v36 = vmax.f32 %v2792_v13, 0.0  ;;  %v2791_v51 = vadd.f32 %v3793_v62, %v2697_v53  ;;  %v2712_v3 = vadd.f32 %v3653_v45, %v5214_v55  ;;  %v3805_v53 = vld [vmem:[%s4197_s19 + $0xe0] sm:$0xff] }
 0x3c8   : > { %v2706_v20 = vpop.f32.mrf.mxu1 }
 0x3c9   : > { %2856 = vst.msk [vmem:[%s5223_s15 + $0x88] sm:$0xff] %vm548_vm0, %v2824_v36  ;;  %v2823_v16 = vmax.f32 %v2791_v51, 0.0  ;;  %v2794_v58 = vadd.f32 %v3794_v21, %v2712_v3  ;;  %v2707_v5 = vadd.f32 %v5214_v55, %v2706_v20  ;;  %v3806_v3 = vld [vmem:[%s4197_s19 + $0xf8] sm:$0xff] }
 0x3ca   : > { %v3656_v48 = vpop.f32.mrf.mxu1 }
 0x3cb   : > { %2855 = vst.msk [vmem:[%s5223_s15 + $0x80] sm:$0xff] %vm548_vm0, %v2823_v16  ;;  %v2826_v12 = vmax.f32 %v2794_v58, 0.0  ;;  %v2793_v61 = vadd.f32 %v3795_v63, %v2707_v5  ;;  %v2722_v18 = vadd.f32 %v3656_v48, %v5214_v55  ;;  %v3807_v58 = vld [vmem:[%s4197_s19 + $0xf0] sm:$0xff]  ;;  %s3986_s19 = smov [#allocation8]  }
 0x3cc   : > { %v2716_v34 = vpop.f32.mrf.mxu1  ;;  %s3896_s27 = sshll.u32 %s3986_s19, 4  ;;  %s3897_s27 = int_to_ptr.vmem [resolvable:$false] %s3896_s27 }
 0x3cd   : > { %2858 = vst.msk [vmem:[%s5223_s15 + $0x98] sm:$0xff] %vm548_vm0, %v2826_v12  ;;  %v2825_v49 = vmax.f32 %v2793_v61, 0.0  ;;  %v2796_v23 = vadd.f32 %v3796_v1, %v2722_v18  ;;  %v2717_v33 = vadd.f32 %v5214_v55, %v2716_v34  ;;  %s3898_s9 = scalar_lea.vmem %s3897_s27, 8192  ;;  %p3899_p4 = scmp.lt.s32.totalorder %s5353_s21, %s3897_s27 }
 0x3ce   : > { %v3659_v40 = vpop.f32.mrf.mxu1  ;;  %p3900_p10 = scmp.lt.s32.totalorder %s3898_s9, %s3892_s26 }
 0x3cf   : > { %2857 = vst.msk [vmem:[%s5223_s15 + $0x90] sm:$0xff] %vm548_vm0, %v2825_v49  ;;  %v2828_v46 = vmax.f32 %v2796_v23, 0.0  ;;  %v2795_v27 = vadd.f32 %v3797_v56, %v2717_v33  ;;  %v2732_v37 = vadd.f32 %v3659_v40, %v5214_v55 }
 0x3d0   : > { %v2726_v39 = vpop.f32.mrf.mxu1  ;;  %p3901_p13 = por %p3900_p10, %p3899_p4 }
 0x3d1   : > { %2860 = vst.msk [vmem:[%s5223_s15 + $0xa8] sm:$0xff] %vm548_vm0, %v2828_v46  ;;  %v2827_v41 = vmax.f32 %v2795_v27, 0.0  ;;  %v2798_v26 = vadd.f32 %v3798_v54, %v2732_v37  ;;  %v2727_v7 = vadd.f32 %v5214_v55, %v2726_v39 }
 0x3d2   : > { %v3662_v57 = vpop.f32.mrf.mxu1  ;;  %p3902_p12 = pnand %p3901_p13, %p3895_p3 }
 0x3d3   : > { %2859 = vst.msk [vmem:[%s5223_s15 + $0xa0] sm:$0xff] %vm548_vm0, %v2827_v41  ;;  %v2830_v17 = vmax.f32 %v2798_v26, 0.0  ;;  %v2797_v38 = vadd.f32 %v3799_v8, %v2727_v7  ;;  %v2742_v50 = vadd.f32 %v3662_v57, %v5214_v55 }
 0x3d4   : > { %v2736_v31 = vpop.f32.mrf.mxu1 }
 0x3d5   : > { %2862 = vst.msk [vmem:[%s5223_s15 + $0xb8] sm:$0xff] %vm548_vm0, %v2830_v17  ;;  %v2829_v44 = vmax.f32 %v2797_v38, 0.0  ;;  %v2800_v2 = vadd.f32 %v3800_v10, %v2742_v50  ;;  %v2737_v35 = vadd.f32 %v5214_v55, %v2736_v31 }
 0x3d6   : > { %v3665_v52 = vpop.f32.mrf.mxu1 }
 0x3d7   : > { %2861 = vst.msk [vmem:[%s5223_s15 + $0xb0] sm:$0xff] %vm548_vm0, %v2829_v44  ;;  %v2832_v60 = vmax.f32 %v2800_v2, 0.0  ;;  %v2799_v24 = vadd.f32 %v3801_v42, %v2737_v35  ;;  %v2752_v43 = vadd.f32 %v3665_v52, %v5214_v55 }
 0x3d8   : > { %v2746_v4 = vpop.f32.mrf.mxu1 }
 0x3d9   : > { %2864 = vst.msk [vmem:[%s5223_s15 + $0xc8] sm:$0xff] %vm548_vm0, %v2832_v60  ;;  %v2831_v14 = vmax.f32 %v2799_v24, 0.0  ;;  %v2802_v59 = vadd.f32 %v3802_v9, %v2752_v43  ;;  %v2747_v32 = vadd.f32 %v5214_v55, %v2746_v4 }
 0x3da   : > { %v3668_v29 = vpop.f32.mrf.mxu1 }
 0x3db   : > { %2863 = vst.msk [vmem:[%s5223_s15 + $0xc0] sm:$0xff] %vm548_vm0, %v2831_v14  ;;  %v2834_v47 = vmax.f32 %v2802_v59, 0.0  ;;  %v2801_v15 = vadd.f32 %v3803_v11, %v2747_v32  ;;  %v2762_v25 = vadd.f32 %v3668_v29, %v5214_v55 }
 0x3dc   : > { %v2756_v19 = vpop.f32.mrf.mxu1 }
 0x3dd   : > { %2866 = vst.msk [vmem:[%s5223_s15 + $0xd8] sm:$0xff] %vm548_vm0, %v2834_v47  ;;  %v2833_v30 = vmax.f32 %v2801_v15, 0.0  ;;  %v2804_v6 = vadd.f32 %v3804_v22, %v2762_v25  ;;  %v2757_v0 = vadd.f32 %v5214_v55, %v2756_v19 }
 0x3de   : > { %v3671_v28 = vpop.f32.mrf.mxu1 }
 0x3df   : > { %2865 = vst.msk [vmem:[%s5223_s15 + $0xd0] sm:$0xff] %vm548_vm0, %v2833_v30  ;;  %v2836_v13 = vmax.f32 %v2804_v6, 0.0  ;;  %v2803_v45 = vadd.f32 %v3805_v53, %v2757_v0  ;;  %v2772_v36 = vadd.f32 %v3671_v28, %v5214_v55 }
 0x3e0   : > { %v2766_v62 = vpop.f32.mrf.mxu1 }
 0x3e1   : > { %2868 = vst.msk [vmem:[%s5223_s15 + $0xe8] sm:$0xff] %vm548_vm0, %v2836_v13  ;;  %v2835_v51 = vmax.f32 %v2803_v45, 0.0  ;;  %v2806_v20 = vadd.f32 %v3806_v3, %v2772_v36  ;;  %v2767_v16 = vadd.f32 %v5214_v55, %v2766_v62 }
 0x3e3   : > { %2867 = vst.msk [vmem:[%s5223_s15 + $0xe0] sm:$0xff] %vm548_vm0, %v2835_v51  ;;  %v2838_v21 = vmax.f32 %v2806_v20, 0.0  ;;  %v2805_v5 = vadd.f32 %v3807_v58, %v2767_v16 }
 0x3e5   : > { %2870 = vst.msk [vmem:[%s5223_s15 + $0xf8] sm:$0xff] %vm548_vm0, %v2838_v21  ;;  %v2837_v48 = vmax.f32 %v2805_v5, 0.0 }
 0x3e7   : > { %2869 = vst.msk [vmem:[%s5223_s15 + $0xf0] sm:$0xff] %vm548_vm0, %v2837_v48 }
 0x3e8   : > { %3905 = shalt.err (!%p3902_p12)
}
 0x3e9   : > { %s3906_s22 = scalar_lea.hbm %s5349_s16, 4096  ;;  %s3910_s24 = scalar_lea.hbm %s5451_s20, 8192 }
 0x3ea   : > { %p3907_p1 = scmp.ne.s32.totalorder %s5349_s16, %s3906_s22  ;;  %p3911_p6 = scmp.lt.s32.totalorder %s5349_s16, %s5451_s20 }
 0x3eb   : > { %p3912_p7 = scmp.lt.s32.totalorder %s3910_s24, %s3906_s22 }
 0x3ec   : > { %p3908_p2 = pnand %p3907_p1, %p4093_p9 }
 0x3ed   : > { %p3913_p8 = por %p3912_p7, %p3911_p6 }
 0x3ee   : > { %p3909_p5 = pneg %p3908_p2 }
 0x3f0   : > { %p3914_p0 = pnand %p3913_p8, %p3909_p5 }
 0x3f2   : > { %3917 = shalt.err (!%p3914_p0)
}
 0x3f3   : > { %s3987_s15 = smov 128  }
 0x3f4   : > { %3684 = dma.vmem_to_hbm [thread:$0]  (%p4093_p9), %s5353_s21, 4096, %s5349_s16, %s2872_s12, %s3987_s15, %s3987_s15, %s3984_s28  }
 0x3f5 PF: > { %s5452_s18 = sld [smem:[#allocation12_spill]]  ;;  %p5454_p3 = scmp.ge.s32.totalorder %s3976_s14, 2 }
 0x3f7   : > { %p3697_p4 = pnand %p5454_p3, %p4100_p11 }
 0x3f9   : > { %p3698_p10 = pneg %p3697_p4 }
 0x3fb   : > { %s2903_s23 = sand.u32 1, %s5452_s18  }
 0x3fc   : > { %s2904_s26 = scalar_lea.sflag [#allocation4], %s2903_s23 }
 0x3fd   : > { %3951 = dma.done.wait (%p3698_p10), %s2904_s26, 4096  }
 0x3fe   : > { %3953 = vsyncadd (%p3698_p10), %s2904_s26, 4294963200  ;;  %s28_s14 = sadd.s32 1, %s3976_s14   ;;  %s5455_s1 = sld [smem:[#allocation13_spill]] }
 0x3ff   : > { %p25_p13 = scmp.ge.s32.totalorder %s28_s14, 4   ;;  %s5456_s11 = sld [smem:[#allocation17_spill]] }
 0x400   : > { %s5457_s12 = sld [smem:[#allocation14_spill]]  ;;  %s5459_s30 = smov %s3960_s10 }
 0x401   : > { %s5458_s13 = sld [smem:[#allocation15_spill]]  ;;  %27 = sbr.rel (!%p25_p13) target bundleno = 11 (0xb), region = 125 }
 0x404   : > { %s5460_s10 = smov %s5455_s1 }
 0x406   :  { %2909 = vsyncpa [#allocation3], 1 }
 0x407   :  { %2911 = vsyncpa [#allocation3 + $0x1], 1 }
 0x408   :  { %2912 = vsyncpa [#allocation6], 1 }
 0x409   :  { %2914 = vsyncpa [#allocation6 + $0x1], 1 }
 0x40a   :  { %2915 = vsyncpa [#allocation4], 1 }
 0x40b   :  { %2917 = vsyncpa [#allocation4 + $0x1], 1 }

</bundles_post_ra>
